<compile_context>
chip_gen: v6e
topology: v6e:2x2x1
jax: 0.10.0
libtpu: 0.0.40
codegen_flags: <defaults>
</compile_context>

<pallas_src>
import numpy as np
import jax
import jax.numpy as jnp
from jax.experimental import pallas as pl
from jax.experimental.pallas import tpu as pltpu


# ----------------------------- glue: coordinate map --------------------------------
def compute_locations_jax(h, w, stride=1):
    # mirrors model/condlane_head.py::compute_locations (torch.meshgrid default 'ij')
    shifts_x = jnp.arange(0, w * stride, stride, dtype=jnp.float32)
    shifts_y = jnp.arange(0, h * stride, stride, dtype=jnp.float32)
    shift_y, shift_x = jnp.meshgrid(shifts_y, shifts_x, indexing="ij")
    shift_x = shift_x.reshape(-1)
    shift_y = shift_y.reshape(-1)
    locations = jnp.stack((shift_x, shift_y), axis=1) + stride // 2
    return locations  # (H*W, 2)


def make_location_map(H, W):
    loc = compute_locations_jax(H, W, 1)                       # (H*W, 2)
    loc = loc[None].transpose(0, 2, 1).reshape(1, 2, H, W)     # (1, 2, H, W)
    # PyTorch code does `locations[:0,:,:] /= H` (no-op, empty slice) and
    # `locations[:1,:,:] /= W` (divides the ENTIRE tensor by W). Reproduce exactly:
    loc = loc / float(W)
    return loc


# ----------------------------- Pallas kernel: per-group packed MLP ------------------
def _make_group_kernel(use_coords):
    if use_coords:
        def kernel(bid_ref, x_ref, coord_ref, w0_ref, b0_ref,
                   w1_ref, b1_ref, w2_ref, b2_ref, out_ref):
            feat = x_ref[0]                                    # (C_in, HW_T)
            w0 = w0_ref[0]                                     # (TI*ch, 2 + C_in)
            # MXU: feature part of layer 0 (stacked over TI instances of the same image)
            h = jnp.dot(w0[:, 2:], feat, preferred_element_type=jnp.float32)
            # VPU: coordinate-channel contribution (K=2 would waste an MXU pass)
            coords = coord_ref[0]                              # (2, HW_T)
            h = h + w0[:, 0:1] * coords[0:1, :] + w0[:, 1:2] * coords[1:2, :] + b0_ref[0]
            h = jnp.maximum(h, 0.0)
            # MXU: block-diagonal middle layer, (TI*ch) x (TI*ch)
            h = jnp.dot(w1_ref[0], h, preferred_element_type=jnp.float32) + b1_ref[0]
            h = jnp.maximum(h, 0.0)
            # MXU: block-diagonal output layer, (TI*oc) x (TI*ch)
            y = jnp.dot(w2_ref[0], h, preferred_element_type=jnp.float32) + b2_ref[0]
            out_ref[0] = y.astype(out_ref.dtype)
    else:
        def kernel(bid_ref, x_ref, w0_ref, b0_ref,
                   w1_ref, b1_ref, w2_ref, b2_ref, out_ref):
            feat = x_ref[0]
            h = jnp.dot(w0_ref[0], feat, preferred_element_type=jnp.float32) + b0_ref[0]
            h = jnp.maximum(h, 0.0)
            h = jnp.dot(w1_ref[0], h, preferred_element_type=jnp.float32) + b1_ref[0]
            h = jnp.maximum(h, 0.0)
            y = jnp.dot(w2_ref[0], h, preferred_element_type=jnp.float32) + b2_ref[0]
            out_ref[0] = y.astype(out_ref.dtype)
    return kernel


# ----------------------------- wrapper: full forward ---------------------------------
def dynamic_mask_head_forward(x, mask_head_params, num_ins, *, channels,
                              out_channels=1, is_mask=True, disable_coords=False,
                              inst_tile=None, hw_tile=None):
    """x: (N, C_in, H, W) float32 (NCHW, as in PyTorch).  Returns (1, num_insts*out_ch, H, W)."""
    N, C_in, H, W = x.shape
    HW = H * W
    num_ins = [int(v) for v in num_ins]
    num_insts = int(sum(num_ins))
    if num_insts == 0:
        return jnp.zeros((1, 0, H, W), jnp.float32)

    Cin2 = C_in + (0 if disable_coords else 2)
    wn = [Cin2 * channels, channels * channels, channels * out_channels]
    bn = [channels, channels, out_channels]
    offs = np.cumsum([0] + wn + bn)
    assert mask_head_params.shape == (num_insts, int(offs[-1]))

    # --- instance-group tiling ----------------------------------------------------
    # TI*channels = 128 fills a 128-row MXU pass (v5e); pass inst_tile=256//channels on
    # v6e/v7x to fill 256 rows.
    TI = inst_tile if inst_tile is not None else max(1, 128 // channels)
    group_img, pad_slot, slot = [], [], 0
    for img, n in enumerate(num_ins):
        g = -(-n // TI)                       # groups for this image (ceil)
        group_img.extend([img] * g)
        pad_slot.extend(range(slot, slot + n))
        slot += g * TI
    G = len(group_img)
    P = G * TI                                # padded instance count
    pad_idx = np.asarray(pad_slot, dtype=np.int32)
    bid = jnp.asarray(group_img, dtype=jnp.int32)            # group -> image index

    # --- pad & parse dynamic params (padded slots get zero weights/biases) ---------
    params_pad = jnp.zeros((P, mask_head_params.shape[1]), mask_head_params.dtype)
    params_pad = params_pad.at[pad_idx].set(mask_head_params)
    w0 = params_pad[:, offs[0]:offs[1]].reshape(G, TI, channels, Cin2) \
                                       .reshape(G, TI * channels, Cin2)
    w1 = params_pad[:, offs[1]:offs[2]].reshape(G, TI, channels, channels)
    w2 = params_pad[:, offs[2]:offs[3]].reshape(G, TI, out_channels, channels)
    b0 = params_pad[:, offs[3]:offs[4]].reshape(G, TI * channels, 1)
    b1 = params_pad[:, offs[4]:offs[5]].reshape(G, TI * channels, 1)
    b2 = params_pad[:, offs[5]:offs[6]].reshape(G, TI * out_channels, 1)
    if is_mask:
        b2 = b2 - 2.19
    # block-diagonal packing: instance t only sees its own hidden channels
    eye = jnp.eye(TI, dtype=params_pad.dtype)
    w1_bd = jnp.einsum('gtab,ts->gtasb', w1, eye).reshape(G, TI * channels, TI * channels)
    w2_bd = jnp.einsum('gtab,ts->gtasb', w2, eye).reshape(G, TI * out_channels, TI * channels)

    # --- features & coords (no concat / no per-instance gather in HBM) -------------
    x_flat = x.reshape(N, C_in, HW)

    # --- HW tiling: lane-dense multiples of 128 when possible ----------------------
    if hw_tile is None:
        hw_tile = HW
        for cand in (2048, 1024, 512, 256, 128):
            if HW % cand == 0:
                hw_tile = cand
                break
    assert HW % hw_tile == 0
    HWT = HW // hw_tile

    TIC = TI * channels
    TIO = TI * out_channels
    kernel = _make_group_kernel(not disable_coords)

    in_specs = [pl.BlockSpec((1, C_in, hw_tile), lambda g, h, bid: (bid[g], 0, h))]
    args = [x_flat]
    if not disable_coords:
        coords = make_location_map(H, W).reshape(1, 2, HW)    # tiny side input
        in_specs.append(pl.BlockSpec((1, 2, hw_tile), lambda g, h, bid: (0, 0, h)))
        args.append(coords)
    in_specs += [
        pl.BlockSpec((1, TIC, Cin2), lambda g, h, bid: (g, 0, 0)),
        pl.BlockSpec((1, TIC, 1),    lambda g, h, bid: (g, 0, 0)),
        pl.BlockSpec((1, TIC, TIC),  lambda g, h, bid: (g, 0, 0)),
        pl.BlockSpec((1, TIC, 1),    lambda g, h, bid: (g, 0, 0)),
        pl.BlockSpec((1, TIO, TIC),  lambda g, h, bid: (g, 0, 0)),
        pl.BlockSpec((1, TIO, 1),    lambda g, h, bid: (g, 0, 0)),
    ]
    args += [w0, b0, w1_bd, b1, w2_bd, b2]

    out = pl.pallas_call(
        kernel,
        out_shape=jax.ShapeDtypeStruct((G, TIO, HW), jnp.float32),
        grid_spec=pltpu.PrefetchScalarGridSpec(
            num_scalar_prefetch=1,
            grid=(G, HWT),
            in_specs=in_specs,
            out_specs=pl.BlockSpec((1, TIO, hw_tile), lambda g, h, bid: (g, 0, h)),
        ),
        compiler_params=pltpu.CompilerParams(
            dimension_semantics=("parallel", "parallel")),
    )(bid, *args)

    # (G, TI*oc, HW) -> drop padded instance slots -> (1, num_insts*oc, H, W)
    out = out.reshape(G * TI, out_channels, HW)[pad_idx]
    return out.reshape(1, num_insts * out_channels, H, W)


# ----------------------------- pure-JAX reference (for self-check) -------------------
def _reference_forward(x, params, num_ins, channels, out_channels, is_mask):
    N, C_in, H, W = x.shape
    loc = jnp.broadcast_to(make_location_map(H, W), (N, 2, H, W))
    x = jnp.concatenate([loc, x], axis=1)
    Cin2 = x.shape[1]
    batch_ids = np.repeat(np.arange(N), np.asarray(num_ins))
    feats = x[batch_ids].reshape(-1, Cin2, H * W)
    num_insts = feats.shape[0]
    wn = [Cin2 * channels, channels * channels, channels * out_channels]
    bn = [channels, channels, out_channels]
    offs = np.cumsum([0] + wn + bn)
    w0 = params[:, offs[0]:offs[1]].reshape(num_insts, channels, Cin2)
    w1 = params[:, offs[1]:offs[2]].reshape(num_insts, channels, channels)
    w2 = params[:, offs[2]:offs[3]].reshape(num_insts, out_channels, channels)
    b0 = params[:, offs[3]:offs[4]].reshape(num_insts, channels, 1)
    b1 = params[:, offs[4]:offs[5]].reshape(num_insts, channels, 1)
    b2 = params[:, offs[5]:offs[6]].reshape(num_insts, out_channels, 1)
    if is_mask:
        b2 = b2 - 2.19
    h = jnp.maximum(jnp.einsum("ick,ikp->icp", w0, feats) + b0, 0.0)
    h = jnp.maximum(jnp.einsum("ick,ikp->icp", w1, h) + b1, 0.0)
    y = jnp.einsum("ick,ikp->icp", w2, h) + b2
    return y.reshape(1, -1, H, W)


if __name__ == "__main__":
    # Small config consistent with the module:
    #   num_layers=3, channels=8, in_channels=4 (+2 coord channels), out_channels=1
    #   weight_nums=[6*8, 8*8, 8*1], bias_nums=[8, 8, 1]  -> num_gen_params = 137
    N, C_in, H, W = 2, 4, 16, 16
    channels, out_channels = 8, 1
    num_ins = [3, 2]
    num_insts = sum(num_ins)
    cin2 = C_in + 2
    num_gen_params = cin2 * channels + channels * channels + channels * out_channels \
        + channels + channels + out_channels

    key = jax.random.PRNGKey(0)
    kx, kp = jax.random.split(key)
    x = jax.random.normal(kx, (N, C_in, H, W), dtype=jnp.float32)
    mask_head_params = 0.1 * jax.random.normal(kp, (num_insts, num_gen_params), dtype=jnp.float32)

    out = dynamic_mask_head_forward(
        x, mask_head_params, num_ins,
        channels=channels, out_channels=out_channels, is_mask=True)
    out = jax.block_until_ready(out)

    ref = _reference_forward(x, mask_head_params, num_ins, channels, out_channels, True)
    assert out.shape == (1, num_insts * out_channels, H, W)
    assert np.allclose(np.asarray(out), np.asarray(ref), atol=1e-4, rtol=1e-4)

    print("KERNEL_OK")
</pallas_src>

<mosaic_0001>
module attributes {stable_mosaic.version = 11 : i64} {
  func.func @kernel(%arg0: i32, %arg1: i32, %arg2: memref<2xi32, #tpu.memory_space<smem>>, %arg3: memref<1x4x256xf32, #tpu.memory_space<vmem>>, %arg4: memref<1x2x256xf32, #tpu.memory_space<vmem>>, %arg5: memref<1x128x6xf32, #tpu.memory_space<vmem>>, %arg6: memref<1x128x1xf32, #tpu.memory_space<vmem>>, %arg7: memref<1x128x128xf32, #tpu.memory_space<vmem>>, %arg8: memref<1x128x1xf32, #tpu.memory_space<vmem>>, %arg9: memref<1x16x128xf32, #tpu.memory_space<vmem>>, %arg10: memref<1x16x1xf32, #tpu.memory_space<vmem>>, %arg11: memref<1x16x256xf32, #tpu.memory_space<vmem>>) attributes {dimension_semantics = [#tpu.dimension_semantics<parallel>, #tpu.dimension_semantics<parallel>], iteration_bounds = array<i64: 2, 1>, scalar_prefetch = 1 : i64, scratch_operands = 0 : i64, tpu.core_type = #tpu.core_type<tc>, window_params = [{transform_indices = @transform_0, window_bounds = array<i64: 1, 4, 256>}, {transform_indices = @transform_1, window_bounds = array<i64: 1, 2, 256>}, {transform_indices = @transform_2, window_bounds = array<i64: 1, 128, 6>}, {transform_indices = @transform_3, window_bounds = array<i64: 1, 128, 1>}, {transform_indices = @transform_4, window_bounds = array<i64: 1, 128, 128>}, {transform_indices = @transform_5, window_bounds = array<i64: 1, 128, 1>}, {transform_indices = @transform_6, window_bounds = array<i64: 1, 16, 128>}, {transform_indices = @transform_7, window_bounds = array<i64: 1, 16, 1>}, {transform_indices = @transform_8, window_bounds = array<i64: 1, 16, 256>}]} {
    %c0 = arith.constant 0 : index
    %c0_0 = arith.constant 0 : index
    %c0_1 = arith.constant 0 : index
    %0 = vector.load %arg3[%c0, %c0_0, %c0_1] : memref<1x4x256xf32, #tpu.memory_space<vmem>>, vector<1x4x256xf32>
    %1 = vector.shape_cast %0 : vector<1x4x256xf32> to vector<4x256xf32>
    %c0_2 = arith.constant 0 : index
    %c0_3 = arith.constant 0 : index
    %c0_4 = arith.constant 0 : index
    %2 = vector.load %arg5[%c0_2, %c0_3, %c0_4] : memref<1x128x6xf32, #tpu.memory_space<vmem>>, vector<1x128x6xf32>
    %3 = vector.shape_cast %2 : vector<1x128x6xf32> to vector<128x6xf32>
    %4 = vector.extract_strided_slice %3 {offsets = [0, 2], sizes = [128, 4], strides = [1, 1]} : vector<128x6xf32> to vector<128x4xf32>
    %cst = arith.constant dense<0.000000e+00> : vector<128x256xf32>
    %5 = tpu.matmul %4, %1, %cst {dimension_numbers = #tpu.dot_dimension_numbers<[1], [0], [0], [1], [0, 0, 1, 1], [], []>} : vector<128x4xf32>, vector<4x256xf32>, vector<128x256xf32> -> vector<128x256xf32>
    %c0_5 = arith.constant 0 : index
    %c0_6 = arith.constant 0 : index
    %c0_7 = arith.constant 0 : index
    %6 = vector.load %arg4[%c0_5, %c0_6, %c0_7] : memref<1x2x256xf32, #tpu.memory_space<vmem>>, vector<1x2x256xf32>
    %7 = vector.shape_cast %6 : vector<1x2x256xf32> to vector<2x256xf32>
    %8 = vector.extract_strided_slice %3 {offsets = [0, 0], sizes = [128, 1], strides = [1, 1]} : vector<128x6xf32> to vector<128x1xf32>
    %9 = vector.extract_strided_slice %7 {offsets = [0, 0], sizes = [1, 256], strides = [1, 1]} : vector<2x256xf32> to vector<1x256xf32>
    %10 = vector.broadcast %8 : vector<128x1xf32> to vector<128x256xf32>
    %11 = vector.broadcast %9 : vector<1x256xf32> to vector<128x256xf32>
    %12 = arith.mulf %10, %11 : vector<128x256xf32>
    %13 = arith.addf %5, %12 : vector<128x256xf32>
    %14 = vector.extract_strided_slice %3 {offsets = [0, 1], sizes = [128, 1], strides = [1, 1]} : vector<128x6xf32> to vector<128x1xf32>
    %15 = vector.extract_strided_slice %7 {offsets = [1, 0], sizes = [1, 256], strides = [1, 1]} : vector<2x256xf32> to vector<1x256xf32>
    %16 = vector.broadcast %14 : vector<128x1xf32> to vector<128x256xf32>
    %17 = vector.broadcast %15 : vector<1x256xf32> to vector<128x256xf32>
    %18 = arith.mulf %16, %17 : vector<128x256xf32>
    %19 = arith.addf %13, %18 : vector<128x256xf32>
    %c0_8 = arith.constant 0 : index
    %c0_9 = arith.constant 0 : index
    %c0_10 = arith.constant 0 : index
    %20 = vector.load %arg6[%c0_8, %c0_9, %c0_10] : memref<1x128x1xf32, #tpu.memory_space<vmem>>, vector<1x128x1xf32>
    %21 = vector.shape_cast %20 : vector<1x128x1xf32> to vector<128x1xf32>
    %22 = vector.broadcast %21 : vector<128x1xf32> to vector<128x256xf32>
    %23 = arith.addf %19, %22 : vector<128x256xf32>
    %cst_11 = arith.constant 0.000000e+00 : f32
    %24 = vector.broadcast %cst_11 : f32 to vector<128x256xf32>
    %25 = arith.maximumf %23, %24 : vector<128x256xf32>
    %c0_12 = arith.constant 0 : index
    %c0_13 = arith.constant 0 : index
    %c0_14 = arith.constant 0 : index
    %26 = vector.load %arg7[%c0_12, %c0_13, %c0_14] : memref<1x128x128xf32, #tpu.memory_space<vmem>>, vector<1x128x128xf32>
    %27 = vector.shape_cast %26 : vector<1x128x128xf32> to vector<128x128xf32>
    %cst_15 = arith.constant dense<0.000000e+00> : vector<128x256xf32>
    %28 = tpu.matmul %27, %25, %cst_15 {dimension_numbers = #tpu.dot_dimension_numbers<[1], [0], [0], [1], [0, 0, 1, 1], [], []>} : vector<128x128xf32>, vector<128x256xf32>, vector<128x256xf32> -> vector<128x256xf32>
    %c0_16 = arith.constant 0 : index
    %c0_17 = arith.constant 0 : index
    %c0_18 = arith.constant 0 : index
    %29 = vector.load %arg8[%c0_16, %c0_17, %c0_18] : memref<1x128x1xf32, #tpu.memory_space<vmem>>, vector<1x128x1xf32>
    %30 = vector.shape_cast %29 : vector<1x128x1xf32> to vector<128x1xf32>
    %31 = vector.broadcast %30 : vector<128x1xf32> to vector<128x256xf32>
    %32 = arith.addf %28, %31 : vector<128x256xf32>
    %cst_19 = arith.constant 0.000000e+00 : f32
    %33 = vector.broadcast %cst_19 : f32 to vector<128x256xf32>
    %34 = arith.maximumf %32, %33 : vector<128x256xf32>
    %c0_20 = arith.constant 0 : index
    %c0_21 = arith.constant 0 : index
    %c0_22 = arith.constant 0 : index
    %35 = vector.load %arg9[%c0_20, %c0_21, %c0_22] : memref<1x16x128xf32, #tpu.memory_space<vmem>>, vector<1x16x128xf32>
    %36 = vector.shape_cast %35 : vector<1x16x128xf32> to vector<16x128xf32>
    %cst_23 = arith.constant dense<0.000000e+00> : vector<16x256xf32>
    %37 = tpu.matmul %36, %34, %cst_23 {dimension_numbers = #tpu.dot_dimension_numbers<[1], [0], [0], [1], [0, 0, 1, 1], [], []>} : vector<16x128xf32>, vector<128x256xf32>, vector<16x256xf32> -> vector<16x256xf32>
    %c0_24 = arith.constant 0 : index
    %c0_25 = arith.constant 0 : index
    %c0_26 = arith.constant 0 : index
    %38 = vector.load %arg10[%c0_24, %c0_25, %c0_26] : memref<1x16x1xf32, #tpu.memory_space<vmem>>, vector<1x16x1xf32>
    %39 = vector.shape_cast %38 : vector<1x16x1xf32> to vector<16x1xf32>
    %40 = vector.broadcast %39 : vector<16x1xf32> to vector<16x256xf32>
    %41 = arith.addf %37, %40 : vector<16x256xf32>
    %c0_27 = arith.constant 0 : index
    %c0_28 = arith.constant 0 : index
    %c0_29 = arith.constant 0 : index
    %42 = vector.load %arg11[%c0_27, %c0_28, %c0_29] : memref<1x16x256xf32, #tpu.memory_space<vmem>>, vector<1x16x256xf32>
    %43 = vector.shape_cast %42 : vector<1x16x256xf32> to vector<16x256xf32>
    %44 = vector.shape_cast %41 : vector<16x256xf32> to vector<1x16x256xf32>
    tpu.vector_store %arg11[%c0_27, %c0_28, %c0_29], %44 {strides = array<i32>} : memref<1x16x256xf32, #tpu.memory_space<vmem>>, vector<1x16x256xf32>,
    return
  }
  func.func @transform_0(%arg0: i32, %arg1: i32, %arg2: memref<2xi32, #tpu.memory_space<smem>>) -> (i32, i32, i32) {
    %0 = arith.index_cast %arg0 : i32 to index
    %1 = memref.load %arg2[%0] : memref<2xi32, #tpu.memory_space<smem>>
    %c0_i32 = arith.constant 0 : i32
    %c0_i32_0 = arith.constant 0 : i32
    return %1, %c0_i32, %arg1 : i32, i32, i32
  }
  func.func @transform_1(%arg0: i32, %arg1: i32, %arg2: memref<2xi32, #tpu.memory_space<smem>>) -> (i32, i32, i32) {
    %c0_i32 = arith.constant 0 : i32
    %c0_i32_0 = arith.constant 0 : i32
    %c0_i32_1 = arith.constant 0 : i32
    return %c0_i32, %c0_i32_0, %arg1 : i32, i32, i32
  }
  func.func @transform_2(%arg0: i32, %arg1: i32, %arg2: memref<2xi32, #tpu.memory_space<smem>>) -> (i32, i32, i32) {
    %c0_i32 = arith.constant 0 : i32
    %c0_i32_0 = arith.constant 0 : i32
    %c0_i32_1 = arith.constant 0 : i32
    return %arg0, %c0_i32, %c0_i32_0 : i32, i32, i32
  }
  func.func @transform_3(%arg0: i32, %arg1: i32, %arg2: memref<2xi32, #tpu.memory_space<smem>>) -> (i32, i32, i32) {
    %c0_i32 = arith.constant 0 : i32
    %c0_i32_0 = arith.constant 0 : i32
    %c0_i32_1 = arith.constant 0 : i32
    return %arg0, %c0_i32, %c0_i32_0 : i32, i32, i32
  }
  func.func @transform_4(%arg0: i32, %arg1: i32, %arg2: memref<2xi32, #tpu.memory_space<smem>>) -> (i32, i32, i32) {
    %c0_i32 = arith.constant 0 : i32
    %c0_i32_0 = arith.constant 0 : i32
    %c0_i32_1 = arith.constant 0 : i32
    return %arg0, %c0_i32, %c0_i32_0 : i32, i32, i32
  }
  func.func @transform_5(%arg0: i32, %arg1: i32, %arg2: memref<2xi32, #tpu.memory_space<smem>>) -> (i32, i32, i32) {
    %c0_i32 = arith.constant 0 : i32
    %c0_i32_0 = arith.constant 0 : i32
    %c0_i32_1 = arith.constant 0 : i32
    return %arg0, %c0_i32, %c0_i32_0 : i32, i32, i32
  }
  func.func @transform_6(%arg0: i32, %arg1: i32, %arg2: memref<2xi32, #tpu.memory_space<smem>>) -> (i32, i32, i32) {
    %c0_i32 = arith.constant 0 : i32
    %c0_i32_0 = arith.constant 0 : i32
    %c0_i32_1 = arith.constant 0 : i32
    return %arg0, %c0_i32, %c0_i32_0 : i32, i32, i32
  }
  func.func @transform_7(%arg0: i32, %arg1: i32, %arg2: memref<2xi32, #tpu.memory_space<smem>>) -> (i32, i32, i32) {
    %c0_i32 = arith.constant 0 : i32
    %c0_i32_0 = arith.constant 0 : i32
    %c0_i32_1 = arith.constant 0 : i32
    return %arg0, %c0_i32, %c0_i32_0 : i32, i32, i32
  }
  func.func @transform_8(%arg0: i32, %arg1: i32, %arg2: memref<2xi32, #tpu.memory_space<smem>>) -> (i32, i32, i32) {
    %c0_i32 = arith.constant 0 : i32
    %c0_i32_0 = arith.constant 0 : i32
    return %arg0, %c0_i32, %arg1 : i32, i32, i32
  }
}

</mosaic_0001>

<bundles_post_ra>
// kernel: tpu_custom_call.1
= control target key start
LH: loop header
LB: loop body
LE: loop exit
PB: predicated region body
PF: predicated region fallthrough
CT: control target
= control target key end

     0   :  { %s2904_s0 = inlined_call_operand.vmem [shape: s32[2], index: 0, kind: input, shape index: {}]   ;;  %s2905_s1 = inlined_call_operand.vmem [shape: f32[2,4,256], index: 1, kind: input, shape index: {}]   ;;  %s2906_s2 = inlined_call_operand.vmem [shape: f32[1,2,256], index: 2, kind: input, shape index: {}]   ;;  %s2907_s3 = inlined_call_operand.vmem [shape: f32[2,128,6], index: 3, kind: input, shape index: {}]   ;;  %s2908_s4 = inlined_call_operand.vmem [shape: f32[2,128,1], index: 4, kind: input, shape index: {}]   ;;  %s2909_s5 = inlined_call_operand.vmem [shape: f32[2,128,128], index: 5, kind: input, shape index: {}]   ;;  %s2910_s6 = inlined_call_operand.vmem [shape: f32[2,128,1], index: 6, kind: input, shape index: {}]   ;;  %s2911_s7 = inlined_call_operand.vmem [shape: f32[2,16,128], index: 7, kind: input, shape index: {}]   ;;  %s2912_s8 = inlined_call_operand.vmem [shape: f32[2,16,1], index: 8, kind: input, shape index: {}]   ;;  %s2913_s9 = inlined_call_operand.hbm [shape: f32[2,16,256], index: 9, kind: output, shape index: {}]  }
   0x1   :  { %s14_s11 = sshll.u32 %s2904_s0, 4  ;;  %s15_s11 = int_to_ptr.vmem [resolvable:$true] %s14_s11 }
   0x2   :  { %s1893_s12 = scalar_lea.vmem %s15_s11, 16  ;;  %p1898_p1 = scmp.lt.s32.totalorder %s15_s11, %s15_s11 }
   0x3   :  { %p1894_p0 = scmp.ne.s32.totalorder %s15_s11, %s1893_s12  ;;  %p1899_p2 = scmp.lt.s32.totalorder %s1893_s12, %s1893_s12 }
   0x5   :  { %p1900_p3 = por %p1899_p2, %p1898_p1 }
   0x7   :  { %p1901_p4 = pnand %p1900_p3, %p1894_p0 }
   0x9   :  { %1904 = shalt.err (!%p1901_p4)  }
   0xa   :  { %s1985_s13 = smov [#allocation3]  }
   0xb   :  { %17 = dma.vmem_to_smem %s15_s11, 16, %s1985_s13, [#allocation2] }
   0xc   :  { %1955 = dma.done.wait [#allocation2], 16 }
   0xd   :  { %1956 = vsyncadd [#allocation2], 4294967280 }
   0xe   :  { %19 = sfence }
   0xf   :  { %20 = vsyncpa [#allocation5], 0 }
  0x10   :  { %22 = vsyncpa [#allocation5 + $0x1], 0  ;;  %s2046_s14 = smov 0   ;;  %s2048_s15 = smov 0  }
  0x11   :  { %s2050_s0 = smov 0   ;;  %s2052_s16 = smov 0  }
  0x12   :  { %s2054_s17 = smov 0   ;;  %s2056_s18 = smov 0  }
  0x13 LB: > { %s1761_s19 = sadd.s32 4294967295, %s1983_s18   ;;  %s1762_s20 = sadd.s32 4294967294, %s1983_s18   ;;  %s1983_s18 = sphi %s2056_s18, %s28_s18   ;;  %s1979_s17 = sphi %s2054_s17, %s3025_s17   ;;  %s1975_s16 = sphi %s2052_s16, %s3024_s16   ;;  %s1971_s0 = sphi %s2050_s0, %s3023_s0   ;;  %s1967_s15 = sphi %s2048_s15, %s3022_s15   ;;  %s1963_s14 = sphi %s2046_s14, %s3021_s14  }
  0x14   : > { %s40_s21 = sadd.s32 1, %s1979_s17  ;;  %s261_s22 = sadd.s32 1, %s1971_s0 }
  0x15   : > { %p42_p5 = scmp.ge.s32.totalorder %s40_s21, 2  ;;  %p271_p6 = scmp.ne.s32.totalorder %s1971_s0, %s1967_s15 }
  0x16   : > { %p272_p7 = scmp.eq.s32.totalorder %s1761_s19, 1  ;;  %p277_p8 = scmp.ne.s32.totalorder %s1967_s15, %s1963_s14 }
  0x17   : > { %s3027_s21 = smov (%p42_p5, %s40_s21), 0  ;;  %p278_p10 = scmp.eq.s32.totalorder %s1762_s20, 1 }
  0x18   : > { %p2086_p9 = por %p272_p7, %p271_p6  ;;  %s256_s24 = ssub.s32 %s1979_s17, %s3027_s21 }
  0x19   : > { %p1766_p11 = scmp.ge.s32.totalorder %s1983_s18, 1  ;;  %p259_p12 = scmp.eq.s32.totalorder %s256_s24, 0 }
  0x1a   : > { %p2093_p13 = por %p278_p10, %p277_p8  ;;  %p368_p0 = scmp.lt.s32.totalorder %s1983_s18, 3 }
  0x1b   : > { %s2099_s26 = scalar_select %p259_p12, %s1971_s0, %s261_s22  }
  0x1c   : > { %p369_p1 = pnand %p1766_p11, %p368_p0 }
  0x1e   : > { %372 = sbr.rel (%p369_p1) target bundleno = 958 (0x3be), region = 52 }
  0x23   : > { %p460_p2 = scmp.lt.s32.totalorder %s1975_s16, 1  ;;  %v1986_v0 = vmov 0   ;;  %v1987_v1 = vmov 1   ;;  %s442_s27 = sld [smem:[#allocation3 + %s1975_s16]]  ;;  %v2914_v2 = vmov 0.0   ;;  %vm707_vm0 = vcmask 1043456  }
  0x24   : > { %1875 = vset.pattern.permute.xlu1 %v1986_v0  ;;  %1878 = vset.pattern.permute.xlu0 %v1987_v1  ;;  %s1989_s12 = smov 126   ;;  %vm674_vm1 = vcmask 31744   ;;  %s1812_s24 = sshll.u32 %s1975_s16, 9 }
  0x25   : > { %s2106_s28 = scalar_select %p460_p2, %s1975_s16, 1  ;;  %776 = vmatprep.mubr.f32.mxu0 %v2914_v2  ;;  %1355 = vmatprep.mubr.f32.mxu1 %v2914_v2 }
  0x26   : > { %s2857_s10 = scalar_lea.hbm %s2913_s9, %s1812_s24 }
  0x27   : > { %s2111_s29 = sshll.u32 %s2106_s28, 7 }
  0x28   : > { %s2117_s11 = scalar_lea.vmem %s2907_s3, %s2111_s29  ;;  %s2180_s30 = scalar_lea.vmem %s2908_s4, %s2111_s29 }
  0x29   : > { %v2120_v3 = vld [vmem:[%s2117_s11] sm:$0xff]  ;;  %v2123_v4 = vld [vmem:[%s2117_s11 + $0x10] sm:$0xff]  ;;  %p444_p3 = scmp.lt.s32.totalorder %s442_s27, 1  ;;  %v2130_v5 = vld [vmem:[%s2117_s11 + $0x8] sm:$0xff] }
  0x2a   : > { %640 = vrot.lane.b32.xlu0 %v2120_v3, %s1989_s12  ;;  %644 = vrot.lane.b32.xlu1 %v2123_v4, %s1989_s12  ;;  %v2133_v6 = vld [vmem:[%s2117_s11 + $0x18] sm:$0xff]  ;;  %v2140_v7 = vld [vmem:[%s2117_s11 + $0x20] sm:$0xff] }
  0x2b   : > { %s3029_s27 = smov (!%p444_p3, %s442_s27), 1  ;;  %v2143_v8 = vld [vmem:[%s2117_s11 + $0x28] sm:$0xff]  ;;  %v2153_v11 = vld [vmem:[%s2117_s11 + $0x30] sm:$0xff]  ;;  %v499_v12 = vld [vmem:[%s2117_s11 + $0x38] sm:$0xff] }
  0x2c   : > { %s1805_s13 = sshll.u32 %s3029_s27, 3  ;;  %v500_v13 = vld [vmem:[%s2117_s11 + $0x40] sm:$0xff]  ;;  %v501_v14 = vld [vmem:[%s2117_s11 + $0x48] sm:$0xff]  ;;  %v502_v15 = vld [vmem:[%s2117_s11 + $0x50] sm:$0xff] }
  0x2d   : > { %s451_s22 = scalar_lea.vmem %s2905_s1, %s1805_s13  ;;  %v503_v16 = vld [vmem:[%s2117_s11 + $0x58] sm:$0xff]  ;;  %v504_v17 = vld [vmem:[%s2117_s11 + $0x60] sm:$0xff]  ;;  %v505_v18 = vld [vmem:[%s2117_s11 + $0x68] sm:$0xff]  ;;  %s1810_s13 = sshll.u32 %s2106_s28, 4 }
  0x2e   : > { %642 = vrot.lane.b32.xlu0 %v2130_v5, %s1989_s12  ;;  %646 = vrot.lane.b32.xlu1 %v2133_v6, %s1989_s12  ;;  %v491_v9 = vld [vmem:[%s451_s22] sm:$0xff]  ;;  %v506_v19 = vld [vmem:[%s2117_s11 + $0x70] sm:$0xff]  ;;  %s2258_s22 = scalar_lea.vmem %s2912_s8, %s1810_s13  ;;  %s484_s19 = scalar_lea.vmem %s2911_s7, %s1810_s13 }
  0x2f   : > { %v673_v10 = vcombine.high %v491_v9, %v491_v9  ;;  %v507_v20 = vld [vmem:[%s2117_s11 + $0x78] sm:$0xff]  ;;  %v1033_v21 = vld [vmem:[%s2180_s30 + $0x70] sm:$0xff]  ;;  %v1032_v22 = vld [vmem:[%s2180_s30 + $0x68] sm:$0xff]  ;;  %s2763_s11 = scalar_lea.vmem %s2909_s5, %s2111_s29  ;;  %s439_s28 = sand.u32 1, %s1967_s15  }
  0x30   : > { %v1034_v23 = vld [vmem:[%s2180_s30 + $0x78] sm:$0xff]  ;;  %v1031_v24 = vld [vmem:[%s2180_s30 + $0x60] sm:$0xff]  ;;  %v1029_v26 = vld [vmem:[%s2180_s30 + $0x50] sm:$0xff]  ;;  %s1767_s13 = sshll.u32 %s439_s28, 5 }
  0x31   : > { %1782 = vmatprep.subr.msk.mxu0 %vm707_vm0, %v673_v10  ;;  %v1030_v25 = vld [vmem:[%s2180_s30 + $0x58] sm:$0xff]  ;;  %v1028_v28 = vld [vmem:[%s2180_s30 + $0x48] sm:$0xff]  ;;  %v1027_v29 = vld [vmem:[%s2180_s30 + $0x40] sm:$0xff]  ;;  %s441_s20 = scalar_lea.vmem [#allocation4], %s1767_s13 }
  0x32   : > { %648 = vrot.lane.b32.xlu0 %v2140_v7, %s1989_s12  ;;  %650 = vrot.lane.b32.xlu1 %v2143_v8, %s1989_s12  ;;  %v1026_v27 = vld [vmem:[%s2180_s30 + $0x38] sm:$0xff]  ;;  %v1021_v31 = vld [vmem:[%s2180_s30 + $0x10] sm:$0xff] }
  0x33   : > { %1783 = vmatpush1.msk.msra.mxu0 %vm707_vm0, %v491_v9  ;;  %v1022_v30 = vld [vmem:[%s2180_s30 + $0x18] sm:$0xff]  ;;  %v1019_v32 = vld [vmem:[%s2180_s30] sm:$0xff]  ;;  %v1025_v35 = vld [vmem:[%s2180_s30 + $0x30] sm:$0xff] }
  0x34   : > { %v1024_v40 = vld [vmem:[%s2180_s30 + $0x28] sm:$0xff]  ;;  %v1023_v46 = vld [vmem:[%s2180_s30 + $0x20] sm:$0xff] }
  0x35   : > { %v1487_v53 = vld [vmem:[%s2258_s22 + $0x8] sm:$0xff] }
  0x36   : > { %652 = vrot.lane.b32.xlu0 %v2153_v11, %s1989_s12  ;;  %654 = vrot.lane.b32.xlu1 %v499_v12, %s1989_s12  ;;  %v1020_v54 = vld [vmem:[%s2180_s30 + $0x8] sm:$0xff] }
  0x3a   : > { %656 = vrot.lane.b32.xlu0 %v500_v13, %s1989_s12  ;;  %658 = vrot.lane.b32.xlu1 %v501_v14, %s1989_s12 }
  0x3e   : > { %660 = vrot.lane.b32.xlu0 %v502_v15, %s1989_s12  ;;  %662 = vrot.lane.b32.xlu1 %v503_v16, %s1989_s12 }
  0x42   : > { %664 = vrot.lane.b32.xlu0 %v504_v17, %s1989_s12  ;;  %666 = vrot.lane.b32.xlu1 %v505_v18, %s1989_s12 }
  0x46   : > { %668 = vrot.lane.b32.xlu0 %v506_v19, %s1989_s12  ;;  %670 = vrot.lane.b32.xlu1 %v507_v20, %s1989_s12  ;;  %s2216_s12 = scalar_lea.vmem %s2910_s6, %s2111_s29  ;;  %s1990_s29 = smov [#allocation4]  }
  0x47   : > { %v1209_v34 = vld [vmem:[%s2216_s12 + $0x70] sm:$0xff]  ;;  %v1207_v38 = vld [vmem:[%s2216_s12 + $0x60] sm:$0xff]  ;;  %v1210_v56 = vld [vmem:[%s2216_s12 + $0x78] sm:$0xff] }
  0x48   : > { %v1205_v39 = vld [vmem:[%s2216_s12 + $0x50] sm:$0xff]  ;;  %v1203_v42 = vld [vmem:[%s2216_s12 + $0x40] sm:$0xff]  ;;  %v1208_v58 = vld [vmem:[%s2216_s12 + $0x68] sm:$0xff] }
  0x49   : > { %v1201_v44 = vld [vmem:[%s2216_s12 + $0x30] sm:$0xff]  ;;  %v1199_v47 = vld [vmem:[%s2216_s12 + $0x20] sm:$0xff]  ;;  %v1206_v60 = vld [vmem:[%s2216_s12 + $0x58] sm:$0xff] }
  0x4a   : > { %581 = vperm.xlu1 %1875, %v506_v19   ;;  %922 = vperm.xlu0 %1878, %v504_v17   ;;  %v1197_v49 = vld [vmem:[%s2216_s12 + $0x10] sm:$0xff]  ;;  %v1195_v51 = vld [vmem:[%s2216_s12] sm:$0xff]  ;;  %v1204_v62 = vld [vmem:[%s2216_s12 + $0x48] sm:$0xff] }
  0x4e   : > { %1876 = vset.pattern.permute.xlu1 %v1987_v1  ;;  %918 = vperm.xlu0 %1878, %v503_v16  }
  0x4f   : > { %934 = vperm.xlu1 %1876, %v507_v20  }
  0x52   : > { %906 = vperm.xlu0 %1878, %v500_v13  }
  0x53   : > { %930 = vperm.xlu1 %1876, %v506_v19  }
  0x56   : > { %902 = vperm.xlu0 %1878, %v499_v12  }
  0x57   : > { %926 = vperm.xlu1 %1876, %v505_v18  }
  0x5a   : > { %890 = vperm.xlu0 %1878, %v2140_v7  }
  0x5b   : > { %1877 = vset.pattern.permute.xlu1 %v1986_v0 }
  0x5c   : > { %566 = vperm.xlu1 %1877, %v503_v16  }
  0x5e   : > { %886 = vperm.xlu0 %1878, %v2133_v6  }
  0x60   : > { %1107 = vperm.xlu1 %1877, %v1033_v21  }
  0x62   : > { %1887 = vset.pattern.permute.xlu0 %v1986_v0 }
  0x63   : > { %586 = vperm.xlu0 %1887, %v507_v20  }
  0x64   : > { %561 = vperm.xlu1 %1877, %v502_v15  }
  0x67   : > { %576 = vperm.xlu0 %1887, %v505_v18  }
  0x68   : > { %1102 = vperm.xlu1 %1877, %v1032_v22  }
  0x6b   : > { %571 = vperm.xlu0 %1887, %v504_v17  }
  0x6c   : > { %1879 = vset.pattern.permute.xlu1 %v1987_v1 }
  0x6d   : > { %914 = vperm.xlu1 %1879, %v502_v15  }
  0x6f   : > { %1112 = vperm.xlu0 %1887, %v1034_v23  }
  0x71   : > { %1880 = vset.pattern.permute.xlu1 %v1986_v0 }
  0x72   : > { %1097 = vperm.xlu1 %1880, %v1031_v24  }
  0x73   : > { %556 = vperm.xlu0 %1887, %v501_v14  }
  0x76   : > { %1881 = vset.pattern.permute.xlu1 %v1987_v1 }
  0x77   : > { %910 = vperm.xlu1 %1881, %v501_v14   ;;  %551 = vperm.xlu0 %1887, %v500_v13  }
  0x7b   : > { %1882 = vset.pattern.permute.xlu1 %v1986_v0  ;;  %1092 = vperm.xlu0 %1887, %v1030_v25  }
  0x7c   : > { %546 = vperm.xlu1 %1882, %v499_v12  }
  0x7f   : > { %536 = vperm.xlu0 %1887, %v2143_v8  }
  0x80   : > { %1087 = vperm.xlu1 %1882, %v1029_v26  }
  0x83   : > { %531 = vperm.xlu0 %1887, %v2140_v7   ;;  %v1486_v7 = vld [vmem:[%s2258_s22] sm:$0xff]  ;;  %s1595_s22 = sshll.u32 %s441_s20, 4  ;;  %s2852_s22 = int_to_ptr.vmem [resolvable:$true] %s1595_s22 }
  0x84   : > { %541 = vperm.xlu1 %1882, %v2153_v11   ;;  %s1905_s16 = scalar_lea.vmem %s2852_s22, 512 }
  0x85   : > { %p1906_p4 = scmp.ne.s32.totalorder %s2852_s22, %s1905_s16 }
  0x87   : > { %1072 = vperm.xlu0 %1887, %v1026_v27   ;;  %p1907_p5 = pnand %p1906_p4, %p2086_p9 }
  0x88   : > { %1082 = vperm.xlu1 %1882, %v1028_v28  }
  0x89   : > { %p1908_p6 = pneg %p1907_p5 }
  0x8b   : > { %516 = vperm.xlu0 %1887, %v2130_v5  }
  0x8c   : > { %1883 = vset.pattern.permute.xlu1 %v1987_v1 }
  0x8d   : > { %898 = vperm.xlu1 %1883, %v2153_v11  }
  0x8f   : > { %511 = vperm.xlu0 %1887, %v2120_v3  }
  0x91   : > { %1884 = vset.pattern.permute.xlu1 %v1986_v0 }
  0x92   : > { %1077 = vperm.xlu1 %1884, %v1027_v29  }
  0x93   : > { %1052 = vperm.xlu0 %1887, %v1022_v30  }
  0x96   : > { %1885 = vset.pattern.permute.xlu1 %v1987_v1 }
  0x97   : > { %894 = vperm.xlu1 %1885, %v2143_v8   ;;  %1047 = vperm.xlu0 %1887, %v1021_v31  }
  0x9b   : > { %1886 = vset.pattern.permute.xlu1 %v1986_v0  ;;  %1037 = vperm.xlu0 %1887, %v1019_v32  }
  0x9c   : > { %v641_v33 = vpop.permute.xlu0 %640  ;;  %526 = vperm.xlu1 %1886, %v2133_v6   ;;  %v645_v37 = vpop.permute.xlu1 %644  ;;  %v1196_v6 = vld [vmem:[%s2216_s12 + $0x8] sm:$0xff] }
  0x9d   : > { %1784 = vmatmul.mubr.msk.f32.vlgmr.msra.gmra.mxu0 %vm674_vm1, %v641_v33 }
  0x9e   : > { %782 = vmatprep.mubr.f32.mxu0 %v2914_v2 }
  0x9f   : > { %1283 = vperm.xlu0 %1887, %v1209_v34  }
  0xa0   : > { %v643_v36 = vpop.permute.xlu0 %642  ;;  %1067 = vperm.xlu1 %1886, %v1025_v35   ;;  %v647_v41 = vpop.permute.xlu1 %646 }
  0xa1   : > { %1785 = vmatmul.mubr.msk.f32.gmra.mxu0 %vm674_vm1, %v643_v36 }
  0xa2   : > { %788 = vmatprep.mubr.f32.mxu0 %v2914_v2 }
  0xa3   : > { %1273 = vperm.xlu0 %1887, %v1207_v38  }
  0xa4   : > { %521 = vperm.xlu1 %1886, %v2123_v4   ;;  %v649_v43 = vpop.permute.xlu0 %648  ;;  %v651_v45 = vpop.permute.xlu1 %650 }
  0xa5   : > { %1786 = vmatmul.mubr.msk.f32.gmra.mxu0 %vm674_vm1, %v645_v37 }
  0xa6   : > { %794 = vmatprep.mubr.f32.mxu0 %v2914_v2 }
  0xa7   : > { %1263 = vperm.xlu0 %1887, %v1205_v39  }
  0xa8   : > { %1062 = vperm.xlu1 %1886, %v1024_v40   ;;  %v653_v48 = vpop.permute.xlu0 %652  ;;  %v655_v50 = vpop.permute.xlu1 %654 }
  0xa9   : > { %1787 = vmatmul.mubr.msk.f32.gmra.mxu0 %vm674_vm1, %v647_v41 }
  0xaa   : > { %800 = vmatprep.mubr.f32.mxu0 %v2914_v2 }
  0xab   : > { %1253 = vperm.xlu0 %1887, %v1203_v42  }
  0xac   : > { %1888 = vset.pattern.permute.xlu1 %v1987_v1  ;;  %v657_v52 = vpop.permute.xlu0 %656  ;;  %v659_v55 = vpop.permute.xlu1 %658 }
  0xad   : > { %1788 = vmatmul.mubr.msk.f32.gmra.mxu0 %vm674_vm1, %v649_v43  ;;  %882 = vperm.xlu1 %1888, %v2123_v4  }
  0xae   : > { %806 = vmatprep.mubr.f32.mxu0 %v2914_v2 }
  0xaf   : > { %1243 = vperm.xlu0 %1887, %v1201_v44  }
  0xb0   : > { %v661_v57 = vpop.permute.xlu0 %660  ;;  %v663_v59 = vpop.permute.xlu1 %662 }
  0xb1   : > { %1789 = vmatmul.mubr.msk.f32.gmra.mxu0 %vm674_vm1, %v651_v45  ;;  %1889 = vset.pattern.permute.xlu1 %v1986_v0 }
  0xb2   : > { %812 = vmatprep.mubr.f32.mxu0 %v2914_v2  ;;  %1057 = vperm.xlu1 %1889, %v1023_v46  }
  0xb3   : > { %1233 = vperm.xlu0 %1887, %v1199_v47  }
  0xb4   : > { %v665_v61 = vpop.permute.xlu0 %664  ;;  %v667_v63 = vpop.permute.xlu1 %666 }
  0xb5   : > { %1790 = vmatmul.mubr.msk.f32.gmra.mxu0 %vm674_vm1, %v653_v48 }
  0xb6   : > { %818 = vmatprep.mubr.f32.mxu0 %v2914_v2  ;;  %1890 = vset.pattern.permute.xlu1 %v1987_v1 }
  0xb7   : > { %878 = vperm.xlu1 %1890, %v2130_v5   ;;  %1223 = vperm.xlu0 %1887, %v1197_v49   ;;  %v1198_v5 = vld [vmem:[%s2216_s12 + $0x18] sm:$0xff] }
  0xb8   : > { %v669_v1 = vpop.permute.xlu0 %668  ;;  %v671_v4 = vpop.permute.xlu1 %670 }
  0xb9   : > { %1791 = vmatmul.mubr.msk.f32.gmra.mxu0 %vm674_vm1, %v655_v50 }
  0xba   : > { %824 = vmatprep.mubr.f32.mxu0 %v2914_v2 }
  0xbb   : > { %874 = vperm.xlu1 %1890, %v2120_v3   ;;  %1213 = vperm.xlu0 %1887, %v1195_v51   ;;  %v1200_v3 = vld [vmem:[%s2216_s12 + $0x28] sm:$0xff] }
  0xbd   : > { %1792 = vmatmul.mubr.msk.f32.gmra.mxu0 %vm674_vm1, %v657_v52 }
  0xbe   : > { %830 = vmatprep.mubr.f32.mxu0 %v2914_v2 }
  0xbf   : > { %1891 = vset.pattern.permute.xlu1 %v1986_v0  ;;  %1495 = vperm.xlu0 %1887, %v1487_v53   ;;  %v1202_v0 = vld [vmem:[%s2216_s12 + $0x38] sm:$0xff]  ;;  %v590_v53 = vlaneseq  ;;  %s1909_s12 = sshll.u32 %s1990_s29, 4  ;;  %s1910_s12 = int_to_ptr.vmem [resolvable:$false] %s1909_s12 }
  0xc0   : > { %1042 = vperm.xlu1 %1891, %v1020_v54   ;;  %p1912_p7 = scmp.lt.s32.totalorder %s2852_s22, %s1910_s12 }
  0xc1   : > { %1793 = vmatmul.mubr.msk.f32.gmra.mxu0 %vm674_vm1, %v659_v55 }
  0xc2   : > { %836 = vmatprep.mubr.f32.mxu0 %v2914_v2 }
  0xc4   : > { %1288 = vperm.xlu1 %1891, %v1210_v56  }
  0xc5   : > { %1794 = vmatmul.mubr.msk.f32.gmra.mxu0 %vm674_vm1, %v661_v57  ;;  %v2290_v8 = vpop.permute.xlu1 %581  ;;  %v2306_v16 = vpop.permute.xlu0 %922 }
  0xc6   : > { %842 = vmatprep.mubr.f32.mxu0 %v2914_v2 }
  0xc8   : > { %1278 = vperm.xlu1 %1891, %v1208_v58   ;;  %v591_v58 = vshrl.u32 %v590_v53, 7 }
  0xc9   : > { %1795 = vmatmul.mubr.msk.f32.gmra.mxu0 %vm674_vm1, %v663_v59  ;;  %v2310_v18 = vpop.permute.xlu0 %918 }
  0xca   : > { %848 = vmatprep.mubr.f32.mxu0 %v2914_v2  ;;  %v2292_v9 = vpop.permute.xlu1 %934 }
  0xcc   : > { %1268 = vperm.xlu1 %1891, %v1206_v60  }
  0xcd   : > { %1796 = vmatmul.mubr.msk.f32.gmra.mxu0 %vm674_vm1, %v665_v61  ;;  %v2314_v20 = vpop.permute.xlu0 %906 }
  0xce   : > { %854 = vmatprep.mubr.f32.mxu0 %v2914_v2  ;;  %v2294_v10 = vpop.permute.xlu1 %930 }
  0xd0   : > { %1258 = vperm.xlu1 %1891, %v1204_v62   ;;  %v592_v62 = vsub.s32 0, %v591_v58 }
  0xd1   : > { %1797 = vmatmul.mubr.msk.f32.gmra.mxu0 %vm674_vm1, %v667_v63  ;;  %v2318_v22 = vpop.permute.xlu0 %902  ;;  %v596_v63 = vsub.s32 2, %v591_v58 }
  0xd2   : > { %860 = vmatprep.mubr.f32.mxu0 %v2914_v2  ;;  %v2296_v11 = vpop.permute.xlu1 %926 }
  0xd4   : > { %1248 = vperm.xlu1 %1891, %v1202_v0  }
  0xd5   : > { %1798 = vmatmul.mubr.msk.f32.gmra.mxu0 %vm674_vm1, %v669_v1  ;;  %v2322_v24 = vpop.permute.xlu0 %890  ;;  %v508_v1 = vld [vmem:[%s2906_s2] sm:$0xf] }
  0xd6   : > { %866 = vmatprep.mubr.f32.mxu0 %v2914_v2  ;;  %v597_v53 = vrot.slane %v508_v1, %v596_v63 }
  0xd7   : > { %v2298_v12 = vpop.permute.xlu1 %566 }
  0xd8   : > { %1238 = vperm.xlu1 %1891, %v1200_v3   ;;  %v939_v3 = vsub.s32 1, %v591_v58 }
  0xd9   : > { %1799 = vmatmul.mubr.msk.f32.gmra.mxu0 %vm674_vm1, %v671_v4  ;;  %v2326_v26 = vpop.permute.xlu0 %886  ;;  %v943_v4 = vsub.s32 3, %v591_v58 }
  0xda   : > { %1562 = vmatprep.mubr.f32.mxu0 %v2914_v2 }
  0xdb   : > { %v2300_v13 = vpop.permute.xlu1 %1107 }
  0xdc   : > { %1228 = vperm.xlu1 %1891, %v1198_v5  }
  0xde   : > { %v2330_v28 = vpop.permute.xlu0 %586 }
  0xdf   : > { %v2302_v14 = vpop.permute.xlu1 %561 }
  0xe0   : > { %1218 = vperm.xlu1 %1891, %v1196_v6  }
  0xe2   : > { %v2334_v30 = vpop.permute.xlu0 %576 }
  0xe3   : > { %v2304_v15 = vpop.permute.xlu1 %1102 }
  0xe4   : > { %1490 = vperm.xlu1 %1891, %v1486_v7   ;;  %v593_v7 = vrot.slane %v508_v1, %v592_v62 }
  0xe6   : > { %v2344_v35 = vpop.permute.xlu0 %571 }
  0xe8   : > { %v2308_v17 = vpop.permute.xlu1 %914 }
  0xea   : > { %v2354_v40 = vpop.permute.xlu0 %1112 }
  0xed   : > { %v2312_v19 = vpop.permute.xlu1 %1097 }
  0xee   : > { %v2364_v45 = vpop.permute.xlu0 %556 }
  0xf2   : > { %v2316_v21 = vpop.permute.xlu1 %910  ;;  %v2374_v50 = vpop.permute.xlu0 %551 }
  0xf6   : > { %v2384_v56 = vpop.permute.xlu0 %1092 }
  0xf7   : > { %v2320_v23 = vpop.permute.xlu1 %546  ;;  %2945 = vst [vmem:[#allocation27_spill] sm:$0xff] %v2384_v56 }
  0xfa   : > { %v2394_v0 = vpop.permute.xlu0 %536 }
  0xfb   : > { %v2324_v25 = vpop.permute.xlu1 %1087 }
  0xfc   : > { %2926 = vst [vmem:[#allocation8_spill] sm:$0xff] %v2324_v25 }
  0xff   : > { %v2328_v27 = vpop.permute.xlu1 %541 }
 0x103   : > { %v2332_v29 = vpop.permute.xlu1 %1082 }
 0x104   : > { %2927 = vst [vmem:[#allocation9_spill] sm:$0xff] %v2332_v29 }
 0x108   : > { %v2340_v33 = vpop.permute.xlu1 %898 }
 0x10d   : > { %v2350_v38 = vpop.permute.xlu1 %1077 }
 0x10e   : > { %2933 = vst [vmem:[#allocation15_spill] sm:$0xff] %v2350_v38 }
 0x112   : > { %v2360_v43 = vpop.permute.xlu1 %894 }
 0x117   : > { %v2370_v48 = vpop.permute.xlu1 %526 }
 0x11b   : > { %v2380_v54 = vpop.permute.xlu1 %1067 }
 0x11c   : > { %2943 = vst [vmem:[#allocation25_spill] sm:$0xff] %v2380_v54  ;;  %v2411_v54 = vrot.slane %v593_v7, %v592_v62 }
 0x11e   : > { %v632_v25 = vmul.f32 %v2411_v54, %v2344_v35  ;;  %v2555_v56 = vmul.f32 %v2411_v54, %v2320_v23 }
 0x11f   : > { %v2390_v60 = vpop.permute.xlu1 %521 }
 0x120   : > { %2962 = vst [vmem:[#allocation44_spill] sm:$0xff] %v2555_v56 }
 0x123   : > { %v2403_v2 = vpop.permute.xlu1 %1062 }
 0x124   : > { %2948 = vst [vmem:[#allocation30_spill] sm:$0xff] %v2403_v2 }
 0x128   : > { %v2421_v63 = vpop.permute.xlu1 %882 }
 0x15d   : > { %v2336_v31 = vpop.f32.mrf.mxu0 }
 0x15e   : > { %2928 = vst [vmem:[#allocation10_spill] sm:$0xff] %v2336_v31  ;;  %v940_v31 = vrot.slane %v508_v1, %v939_v3 }
 0x15f   : > { %v2338_v32 = vpop.f32.mrf.mxu0 }
 0x160   : > { %2929 = vst [vmem:[#allocation11_spill] sm:$0xff] %v2338_v32  ;;  %v944_v32 = vrot.slane %v508_v1, %v943_v4  ;;  %v2415_v58 = vrot.slane %v940_v31, %v939_v3  ;;  %v636_v1 = vmul.f32 %v2411_v54, %v2290_v8 }
 0x161   : > { %v2342_v34 = vpop.f32.mrf.mxu0 }
 0x162   : > { %2930 = vst [vmem:[#allocation12_spill] sm:$0xff] %v2342_v34 }
 0x163   : > { %v2346_v36 = vpop.f32.mrf.mxu0 }
 0x164   : > { %2931 = vst [vmem:[#allocation13_spill] sm:$0xff] %v2346_v36  ;;  %v2407_v36 = vpop.permute.xlu0 %531 }
 0x165   : > { %v2348_v37 = vpop.f32.mrf.mxu0 }
 0x166   : > { %2932 = vst [vmem:[#allocation14_spill] sm:$0xff] %v2348_v37 }
 0x167   : > { %v2352_v39 = vpop.f32.mrf.mxu0 }
 0x168   : > { %2934 = vst [vmem:[#allocation16_spill] sm:$0xff] %v2352_v39  ;;  %v2413_v39 = vrot.slane %v597_v53, %v592_v62  ;;  %v2431_v62 = vmul.f32 %v2415_v58, %v2306_v16 }
 0x169   : > { %v2356_v41 = vpop.f32.mrf.mxu0 }
 0x16a   : > { %2935 = vst [vmem:[#allocation17_spill] sm:$0xff] %v2356_v41  ;;  %v2417_v41 = vrot.slane %v944_v32, %v939_v3  ;;  %v637_v4 = vmul.f32 %v2413_v39, %v2290_v8  ;;  %v2437_v32 = vpop.permute.xlu0 %1072  ;;  %v2441_v3 = vmul.f32 %v2415_v58, %v2292_v9  ;;  %v2449_v8 = vmul.f32 %v2415_v58, %v2310_v18 }
 0x16b   : > { %v2358_v42 = vpop.f32.mrf.mxu0  ;;  %2949 = vst [vmem:[#allocation31_spill] sm:$0xff] %v2437_v32  ;;  %v983_v32 = vmul.f32 %v2415_v58, %v2294_v10  ;;  %v2575_v56 = vmul.f32 %v2413_v39, %v2394_v0 }
 0x16c   : > { %2936 = vst [vmem:[#allocation18_spill] sm:$0xff] %v2358_v42  ;;  %v2435_v31 = vmul.f32 %v2417_v41, %v2306_v16  ;;  %v2445_v7 = vmul.f32 %v2417_v41, %v2292_v9  ;;  %v2453_v53 = vmul.f32 %v2417_v41, %v2310_v18  ;;  %v2463_v9 = vmul.f32 %v2415_v58, %v2314_v20 }
 0x16d   : > { %v2362_v44 = vpop.f32.mrf.mxu0  ;;  %v2467_v38 = vmul.f32 %v2417_v41, %v2314_v20  ;;  %v2471_v18 = vmul.f32 %v2415_v58, %v2296_v11  ;;  %v2487_v20 = vmul.f32 %v2411_v54, %v2298_v12  ;;  %2965 = vst [vmem:[#allocation47_spill] sm:$0xff] %v2575_v56 }
 0x16e   : > { %2937 = vst [vmem:[#allocation19_spill] sm:$0xff] %v2362_v44  ;;  %v984_v44 = vmul.f32 %v2417_v41, %v2294_v10  ;;  %2950 = vst [vmem:[#allocation32_spill] sm:$0xff] %v2463_v9  ;;  %v2483_v10 = vmul.f32 %v2417_v41, %v2318_v22  ;;  %v2501_v9 = vpop.permute.xlu1 %1057 }
 0x16f   : > { %v2366_v46 = vpop.f32.mrf.mxu0  ;;  %2951 = vst [vmem:[#allocation33_spill] sm:$0xff] %v2467_v38  ;;  %2956 = vst [vmem:[#allocation38_spill] sm:$0xff] %v2501_v9  ;;  %v2521_v9 = vmul.f32 %v2413_v39, %v2302_v14 }
 0x170   : > { %2938 = vst [vmem:[#allocation20_spill] sm:$0xff] %v2366_v46  ;;  %v2475_v46 = vmul.f32 %v2417_v41, %v2296_v11  ;;  %2953 = vst [vmem:[#allocation35_spill] sm:$0xff] %v2483_v10  ;;  %v2495_v11 = vmul.f32 %v2415_v58, %v2322_v24  ;;  %v2509_v10 = vmul.f32 %v2417_v41, %v2326_v26 }
 0x171   : > { %v2368_v47 = vpop.f32.mrf.mxu0 }
 0x172   : > { %2939 = vst [vmem:[#allocation21_spill] sm:$0xff] %v2368_v47  ;;  %v2479_v47 = vmul.f32 %v2415_v58, %v2318_v22  ;;  %2954 = vst [vmem:[#allocation36_spill] sm:$0xff] %v2495_v11  ;;  %v2505_v22 = vmul.f32 %v2415_v58, %v2326_v26  ;;  %v639_v11 = vmul.f32 %v2413_v39, %v2330_v28 }
 0x173   : > { %v2372_v49 = vpop.f32.mrf.mxu0  ;;  %2958 = vst [vmem:[#allocation40_spill] sm:$0xff] %v2509_v10  ;;  %v635_v26 = vmul.f32 %v2413_v39, %v2334_v30  ;;  %v517_v10 = vpop.permute.xlu0 %516 }
 0x174   : > { %2940 = vst [vmem:[#allocation22_spill] sm:$0xff] %v2372_v49  ;;  %2952 = vst [vmem:[#allocation34_spill] sm:$0xff] %v2479_v47  ;;  %v2491_v49 = vmul.f32 %v2413_v39, %v2298_v12  ;;  %v2499_v47 = vmul.f32 %v2417_v41, %v2322_v24  ;;  %v638_v12 = vmul.f32 %v2411_v54, %v2330_v28 }
 0x175   : > { %v2376_v51 = vpop.f32.mrf.mxu0  ;;  %2957 = vst [vmem:[#allocation39_spill] sm:$0xff] %v2505_v22  ;;  %v2517_v24 = vmul.f32 %v2411_v54, %v2302_v14  ;;  %v634_v22 = vmul.f32 %v2411_v54, %v2334_v30  ;;  %v2533_v28 = vmul.f32 %v2417_v41, %v2308_v17  ;;  %v633_v14 = vmul.f32 %v2413_v39, %v2344_v35 }
 0x176   : > { %2941 = vst [vmem:[#allocation23_spill] sm:$0xff] %v2376_v51  ;;  %2955 = vst [vmem:[#allocation37_spill] sm:$0xff] %v2499_v47  ;;  %v2529_v47 = vmul.f32 %v2415_v58, %v2308_v17  ;;  %v2545_v30 = vmul.f32 %v2417_v41, %v2316_v21  ;;  %v627_v17 = vmul.f32 %v2413_v39, %v2364_v45 }
 0x177   : > { %v2378_v52 = vpop.f32.mrf.mxu0  ;;  %v2559_v35 = vmul.f32 %v2413_v39, %v2320_v23  ;;  %v2579_v23 = vmul.f32 %v2411_v54, %v2407_v36 }
 0x178   : > { %2942 = vst [vmem:[#allocation24_spill] sm:$0xff] %v2378_v52  ;;  %2959 = vst [vmem:[#allocation41_spill] sm:$0xff] %v2529_v47  ;;  %v2541_v52 = vmul.f32 %v2415_v58, %v2316_v21  ;;  %v2567_v21 = vmul.f32 %v2413_v39, %v2374_v50  ;;  %v2583_v47 = vmul.f32 %v2411_v54, %v2328_v27 }
 0x179   : > { %v2382_v55 = vpop.f32.mrf.mxu0  ;;  %2961 = vst [vmem:[#allocation43_spill] sm:$0xff] %v2545_v30  ;;  %2963 = vst [vmem:[#allocation45_spill] sm:$0xff] %v2559_v35 }
 0x17a   : > { %2944 = vst [vmem:[#allocation26_spill] sm:$0xff] %v2382_v55  ;;  %2960 = vst [vmem:[#allocation42_spill] sm:$0xff] %v2541_v52  ;;  %v2549_v55 = vmul.f32 %v2411_v54, %v2364_v45  ;;  %v2563_v52 = vmul.f32 %v2411_v54, %v2374_v50  ;;  %v2571_v45 = vmul.f32 %v2411_v54, %v2394_v0 }
 0x17b   : > { %v2386_v57 = vpop.f32.mrf.mxu0  ;;  %2966 = vst [vmem:[#allocation48_spill] sm:$0xff] %v2579_v23  ;;  %2967 = vst [vmem:[#allocation49_spill] sm:$0xff] %v2583_v47  ;;  %v2587_v50 = vmul.f32 %v2413_v39, %v2328_v27  ;;  %v2594_v0 = vmul.f32 %v2411_v54, %v517_v10  ;;  %v2598_v23 = vmul.f32 %v2415_v58, %v2340_v33 }
 0x17c   : > { %2946 = vst [vmem:[#allocation28_spill] sm:$0xff] %v2386_v57  ;;  %2964 = vst [vmem:[#allocation46_spill] sm:$0xff] %v2571_v45  ;;  %v879_v57 = vpop.permute.xlu1 %878  ;;  %v2591_v45 = vmul.f32 %v2413_v39, %v2407_v36  ;;  %v2605_v27 = vmul.f32 %v2417_v41, %v2340_v33  ;;  %v2609_v36 = vmul.f32 %v2415_v58, %v2360_v43 }
 0x17d   : > { %v2388_v59 = vpop.f32.mrf.mxu0  ;;  %2969 = vst [vmem:[#allocation51_spill] sm:$0xff] %v2594_v0  ;;  %2970 = vst [vmem:[#allocation52_spill] sm:$0xff] %v2598_v23  ;;  %v2623_v33 = vmul.f32 %v2411_v54, %v2370_v48 }
 0x17e   : > { %2947 = vst [vmem:[#allocation29_spill] sm:$0xff] %v2388_v59  ;;  %2968 = vst [vmem:[#allocation50_spill] sm:$0xff] %v2591_v45 }
 0x17f   : > { %v2392_v61 = vpop.f32.mrf.mxu0 }
 0x181   : > { %v2399_v5 = vpop.f32.mrf.mxu0 }
 0x183   : > { %v2401_v6 = vpop.f32.mrf.mxu0 }
 0x185   : > { %v2405_v34 = vpop.f32.mrf.mxu0 }
 0x187   : > { %v2409_v37 = vpop.f32.mrf.mxu0 }
 0x189   : > { %v2419_v42 = vpop.f32.mrf.mxu0 }
 0x18b   : > { %v2423_v2 = vpop.f32.mrf.mxu0 }
 0x18d   : > { %v2455_v16 = vpop.f32.mrf.mxu0 }
 0x18f   : > { %v852_v29 = vpop.f32.mrf.mxu0 }
 0x191   : > { %v856_v51 = vpop.f32.mrf.mxu0 }
 0x193   : > { %v858_v38 = vpop.f32.mrf.mxu0 }
 0x195   : > { %v862_v30 = vpop.f32.mrf.mxu0 }
 0x196   : > { %v863_v35 = vadd.f32 %v862_v30, %v636_v1  ;;  %v2601_v1 = vmul.f32 %v2413_v39, %v517_v10  ;;  %v512_v30 = vpop.permute.xlu0 %511  ;;  %v2619_v10 = vmul.f32 %v2417_v41, %v2360_v43  ;;  %v2635_v43 = vmul.f32 %v2413_v39, %v2390_v60 }
 0x197   : > { %v864_v56 = vpop.f32.mrf.mxu0  ;;  %v2612_v0 = vmul.f32 %v2411_v54, %v512_v30  ;;  %v2615_v45 = vmul.f32 %v2413_v39, %v512_v30  ;;  %v2631_v30 = vmul.f32 %v2411_v54, %v2390_v60  ;;  %v851_v54 = vadd.f32 %v2455_v16, %v632_v25 }
 0x198   : > { %v1015_v47 = vadd.f32 %v983_v32, %v863_v35  ;;  %v865_v59 = vadd.f32 %v864_v56, %v637_v4  ;;  %v859_v56 = vadd.f32 %v858_v38, %v635_v26  ;;  %v2627_v35 = vmul.f32 %v2413_v39, %v2370_v48  ;;  %v875_v38 = vpop.permute.xlu1 %874 }
 0x199   : > { %2971 = vst [vmem:[#allocation53_spill] sm:$0xff] %v2612_v0  ;;  %2972 = vst [vmem:[#allocation54_spill] sm:$0xff] %v2615_v45  ;;  %v868_v23 = vpop.f32.mrf.mxu0  ;;  %v857_v0 = vadd.f32 %v856_v51, %v634_v22  ;;  %v2640_v26 = vmul.f32 %v2415_v58, %v2421_v63  ;;  %v2644_v48 = vmul.f32 %v2417_v41, %v2421_v63 }
 0x19a   : > { %v1016_v4 = vadd.f32 %v984_v44, %v865_v59  ;;  %v869_v32 = vadd.f32 %v868_v23, %v638_v12  ;;  %v853_v44 = vadd.f32 %v852_v29, %v633_v14  ;;  %v2647_v51 = vmul.f32 %v2415_v58, %v879_v57  ;;  %v2977_v23 = vld [vmem:[#allocation43_spill] sm:$0xff] }
 0x19b   : > { %v870_v45 = vpop.f32.mrf.mxu0  ;;  %v2651_v39 = vmul.f32 %v2417_v41, %v879_v57  ;;  %v847_v29 = vadd.f32 %v2423_v2, %v2491_v49  ;;  %v1014_v60 = vadd.f32 %v2475_v46, %v859_v56  ;;  %v845_v63 = vadd.f32 %v2419_v42, %v2487_v20  ;;  %v2979_v56 = vld [vmem:[#allocation44_spill] sm:$0xff] }
 0x19c   : > { %v1017_v59 = vadd.f32 %v2441_v3, %v869_v32  ;;  %v871_v12 = vadd.f32 %v870_v45, %v639_v11  ;;  %v2658_v11 = vmul.f32 %v2415_v58, %v875_v38  ;;  %v1013_v22 = vadd.f32 %v2471_v18, %v857_v0 }
 0x19d   : > { %v841_v57 = vadd.f32 %v2409_v37, %v2521_v9  ;;  %v1012_v16 = vadd.f32 %v2435_v31, %v853_v44  ;;  %v1144_v46 = vadd.f32 %v2300_v13, %v1016_v4  ;;  %v2670_v49 = vmul.f32 %v2417_v41, %v875_v38  ;;  %v2980_v4 = vld [vmem:[#allocation26_spill] sm:$0xff] }
 0x19e   : > { %v1018_v3 = vadd.f32 %v2445_v7, %v871_v12  ;;  %v1145_v25 = vadd.f32 %v2354_v40, %v1017_v59  ;;  %v839_v58 = vadd.f32 %v2405_v34, %v2517_v24  ;;  %v1011_v42 = vadd.f32 %v2431_v62, %v851_v54  ;;  %v2973_v62 = vld [vmem:[#allocation29_spill] sm:$0xff]  ;;  %v2981_v38 = vld [vmem:[#allocation42_spill] sm:$0xff] }
 0x19f   : > { %v1143_v7 = vadd.f32 %v2300_v13, %v1015_v47  ;;  %v835_v18 = vadd.f32 %v2401_v6, %v627_v17  ;;  %v1010_v37 = vadd.f32 %v2453_v53, %v847_v29  ;;  %v1142_v31 = vadd.f32 %v2304_v15, %v1014_v60  ;;  %v2974_v24 = vld [vmem:[#allocation41_spill] sm:$0xff] }
 0x1a0   : > { %v1146_v2 = vadd.f32 %v2354_v40, %v1018_v3  ;;  %v833_v40 = vadd.f32 %v2399_v5, %v2549_v55  ;;  %v1009_v41 = vadd.f32 %v2449_v8, %v845_v63  ;;  %v1177_v20 = vmax.f32 %v1145_v25, 0.0  ;;  %v2975_v8 = vld [vmem:[#allocation45_spill] sm:$0xff]  ;;  %v2984_v3 = vld [vmem:[#allocation8_spill] sm:$0xff]  ;;  %v2986_v25 = vld [vmem:[#allocation23_spill] sm:$0xff] }
 0x1a1   : > { %v1141_v14 = vadd.f32 %v2304_v15, %v1013_v22  ;;  %v829_v34 = vadd.f32 %v2392_v61, %v2567_v21  ;;  %v1008_v13 = vadd.f32 %v2533_v28, %v841_v57  ;;  %v1176_v47 = vmax.f32 %v1144_v46, 0.0  ;;  %v2976_v15 = vld [vmem:[#allocation28_spill] sm:$0xff]  ;;  %v2978_v21 = vld [vmem:[#allocation27_spill] sm:$0xff]  ;;  %v2983_v54 = vld [vmem:[#allocation33_spill] sm:$0xff] }
 0x1a2   : > { %v1178_v9 = vmax.f32 %v1146_v2, 0.0  ;;  %v1140_v6 = vadd.f32 %v2312_v19, %v1012_v16  ;;  %v827_v53 = vadd.f32 %v2973_v62, %v2563_v52  ;;  %v1007_v17 = vadd.f32 %v2974_v24, %v839_v58  ;;  %v2985_v22 = vld [vmem:[#allocation49_spill] sm:$0xff]  ;;  %v2987_v16 = vld [vmem:[#allocation32_spill] sm:$0xff]  ;;  %v2995_v62 = vld [vmem:[#allocation50_spill] sm:$0xff] }
 0x1a3   : > { %v1175_v55 = vmax.f32 %v1143_v7, 0.0  ;;  %v1139_v5 = vadd.f32 %v2312_v19, %v1011_v42  ;;  %v823_v45 = vadd.f32 %v2976_v15, %v2975_v8  ;;  %v1006_v61 = vadd.f32 %v2977_v23, %v835_v18  ;;  %v2982_v19 = vld [vmem:[#allocation24_spill] sm:$0xff]  ;;  %v2988_v42 = vld [vmem:[#allocation47_spill] sm:$0xff]  ;;  %v2989_v7 = vld [vmem:[#allocation22_spill] sm:$0xff] }
 0x1a4   : > { %1291 = vmatprep.subr.mxu1 %v1178_v9  ;;  %v1174_v28 = vmax.f32 %v1142_v31, 0.0  ;;  %v1138_v0 = vadd.f32 %v2978_v21, %v1010_v37  ;;  %v821_v32 = vadd.f32 %v2980_v4, %v2979_v56  ;;  %v1005_v52 = vadd.f32 %v2981_v38, %v833_v40  ;;  %v2990_v37 = vld [vmem:[#allocation35_spill] sm:$0xff]  ;;  %v2991_v31 = vld [vmem:[#allocation9_spill] sm:$0xff]  ;;  %v2998_v15 = vld [vmem:[#allocation48_spill] sm:$0xff]  ;;  %v1053_v56 = vpop.permute.xlu0 %1052 }
 0x1a5   : > { %1292 = vmatpush1.msra.mxu1 %v1177_v20  ;;  %v1173_v44 = vmax.f32 %v1141_v14, 0.0  ;;  %v1137_v59 = vadd.f32 %v2978_v21, %v1009_v41  ;;  %v817_v12 = vadd.f32 %v2982_v19, %v2587_v50  ;;  %v1004_v29 = vadd.f32 %v2983_v54, %v829_v34  ;;  %v2992_v41 = vld [vmem:[#allocation46_spill] sm:$0xff]  ;;  %v2993_v20 = vld [vmem:[#allocation21_spill] sm:$0xff] }
 0x1a6   : > { %1293 = vmatprep.subr.mxu1 %v1176_v47  ;;  %v1172_v60 = vmax.f32 %v1140_v6, 0.0  ;;  %v1136_v63 = vadd.f32 %v2984_v3, %v1008_v13  ;;  %v815_v57 = vadd.f32 %v2986_v25, %v2985_v22  ;;  %v1003_v2 = vadd.f32 %v2987_v16, %v827_v53  ;;  %v2994_v34 = vld [vmem:[#allocation34_spill] sm:$0xff]  ;;  %v2996_v53 = vld [vmem:[#allocation20_spill] sm:$0xff]  ;;  %v3006_v22 = vld [vmem:[#allocation25_spill] sm:$0xff] }
 0x1a7   : > { %1294 = vmatpush1.msra.mxu1 %v1175_v55  ;;  %v1171_v46 = vmax.f32 %v1139_v5, 0.0  ;;  %v1135_v58 = vadd.f32 %v2984_v3, %v1007_v17  ;;  %v811_v18 = vadd.f32 %v2989_v7, %v2988_v42  ;;  %v1002_v50 = vadd.f32 %v2990_v37, %v823_v45  ;;  %v2997_v5 = vld [vmem:[#allocation15_spill] sm:$0xff]  ;;  %v3001_v4 = vld [vmem:[#allocation18_spill] sm:$0xff]  ;;  %v3010_v7 = vld [vmem:[#allocation40_spill] sm:$0xff] }
 0x1a8   : > { %1295 = vmatprep.subr.mxu1 %v1174_v28  ;;  %v1170_v9 = vmax.f32 %v1138_v0, 0.0  ;;  %v1134_v40 = vadd.f32 %v2991_v31, %v1006_v61  ;;  %v809_v14 = vadd.f32 %v2993_v20, %v2992_v41  ;;  %v1001_v13 = vadd.f32 %v2994_v34, %v821_v32  ;;  %v2999_v45 = vld [vmem:[#allocation19_spill] sm:$0xff]  ;;  %v3000_v61 = vld [vmem:[#allocation52_spill] sm:$0xff]  ;;  %v3011_v37 = vld [vmem:[#allocation30_spill] sm:$0xff]  ;;  %v1048_v34 = vpop.permute.xlu0 %1047 }
 0x1a9   : > { %1296 = vmatpush1.msra.mxu1 %v1173_v44  ;;  %v1169_v47 = vmax.f32 %v1137_v59, 0.0  ;;  %v1133_v6 = vadd.f32 %v2991_v31, %v1005_v52  ;;  %v805_v24 = vadd.f32 %v2996_v53, %v2995_v62  ;;  %v1000_v17 = vadd.f32 %v2605_v27, %v817_v12  ;;  %v3002_v52 = vld [vmem:[#allocation31_spill] sm:$0xff]  ;;  %v3003_v59 = vld [vmem:[#allocation17_spill] sm:$0xff]  ;;  %v3013_v31 = vld [vmem:[#allocation12_spill] sm:$0xff] }
 0x1aa   : > { %1297 = vmatprep.subr.mxu1 %v1172_v60  ;;  %v1168_v55 = vmax.f32 %v1136_v63, 0.0  ;;  %v1132_v8 = vadd.f32 %v2997_v5, %v1004_v29  ;;  %v803_v23 = vadd.f32 %v2999_v45, %v2998_v15  ;;  %v999_v28 = vadd.f32 %v3000_v61, %v815_v57  ;;  %v3004_v60 = vld [vmem:[#allocation16_spill] sm:$0xff]  ;;  %v3005_v63 = vld [vmem:[#allocation37_spill] sm:$0xff]  ;;  %v3007_v57 = vld [vmem:[#allocation14_spill] sm:$0xff] }
 0x1ab   : > { %1298 = vmatpush1.msra.mxu1 %v1171_v46  ;;  %v1167_v21 = vmax.f32 %v1135_v58, 0.0  ;;  %v1131_v0 = vadd.f32 %v2997_v5, %v1003_v2  ;;  %v799_v32 = vadd.f32 %v3001_v4, %v2627_v35  ;;  %v998_v38 = vadd.f32 %v2619_v10, %v811_v18  ;;  %v3008_v2 = vld [vmem:[#allocation36_spill] sm:$0xff]  ;;  %v3009_v58 = vld [vmem:[#allocation13_spill] sm:$0xff]  ;;  %v3014_v41 = vld [vmem:[#allocation39_spill] sm:$0xff] }
 0x1ac   : > { %1299 = vmatprep.subr.mxu1 %v1170_v9  ;;  %v1166_v27 = vmax.f32 %v1134_v40, 0.0  ;;  %v1130_v44 = vadd.f32 %v3002_v52, %v1002_v50  ;;  %v797_v19 = vadd.f32 %v3003_v59, %v2623_v33  ;;  %v997_v12 = vadd.f32 %v2609_v36, %v809_v14  ;;  %v3012_v9 = vld [vmem:[#allocation51_spill] sm:$0xff]  ;;  %v3017_v53 = vld [vmem:[#allocation38_spill] sm:$0xff] }
 0x1ad   : > { %1300 = vmatpush1.msra.mxu1 %v1169_v47  ;;  %v1165_v54 = vmax.f32 %v1133_v6, 0.0  ;;  %v1129_v29 = vadd.f32 %v3002_v52, %v1001_v13  ;;  %v793_v3 = vadd.f32 %v3004_v60, %v2635_v43  ;;  %v996_v35 = vadd.f32 %v3005_v63, %v805_v24  ;;  %v3015_v13 = vld [vmem:[#allocation54_spill] sm:$0xff]  ;;  %v3016_v47 = vld [vmem:[#allocation11_spill] sm:$0xff] }
 0x1ae   : > { %1301 = vmatprep.subr.mxu1 %v1168_v55  ;;  %v1164_v10 = vmax.f32 %v1132_v8, 0.0  ;;  %v1128_v25 = vadd.f32 %v3006_v22, %v1000_v17  ;;  %v791_v16 = vadd.f32 %v3007_v57, %v2631_v30  ;;  %v995_v33 = vadd.f32 %v3008_v2, %v803_v23  ;;  %v3018_v17 = vld [vmem:[#allocation53_spill] sm:$0xff]  ;;  %v3019_v55 = vld [vmem:[#allocation10_spill] sm:$0xff]  ;;  %v1182_v57 = vld [vmem:[%s2763_s11 + $0x18] sm:$0xff] }
 0x1af   : > { %1302 = vmatpush1.msra.mxu1 %v1167_v21  ;;  %v1163_v36 = vmax.f32 %v1131_v0, 0.0  ;;  %v1127_v46 = vadd.f32 %v3006_v22, %v999_v28  ;;  %v787_v42 = vadd.f32 %v3009_v58, %v2601_v1  ;;  %v994_v43 = vadd.f32 %v3010_v7, %v799_v32  ;;  %v1043_v32 = vpop.permute.xlu1 %1042  ;;  %v1180_v22 = vld [vmem:[%s2763_s11 + $0x8] sm:$0xff]  ;;  %v1190_v7 = vld [vmem:[%s2763_s11 + $0x58] sm:$0xff] }
 0x1b0   : > { %1303 = vmatprep.subr.mxu1 %v1166_v27  ;;  %v1162_v18 = vmax.f32 %v1130_v44, 0.0  ;;  %v1126_v50 = vadd.f32 %v3011_v37, %v998_v38  ;;  %v785_v40 = vadd.f32 %v3013_v31, %v3012_v9  ;;  %v993_v30 = vadd.f32 %v3014_v41, %v797_v19  ;;  %v1184_v2 = vld [vmem:[%s2763_s11 + $0x28] sm:$0xff] }
 0x1b1   : > { %1304 = vmatpush1.msra.mxu1 %v1165_v54  ;;  %v1161_v20 = vmax.f32 %v1129_v29, 0.0  ;;  %v1125_v14 = vadd.f32 %v3011_v37, %v997_v12  ;;  %v781_v6 = vadd.f32 %v3016_v47, %v3015_v13  ;;  %v992_v1 = vadd.f32 %v2644_v48, %v793_v3  ;;  %v1188_v58 = vld [vmem:[%s2763_s11 + $0x48] sm:$0xff]  ;;  %v1193_v37 = vld [vmem:[%s2763_s11 + $0x70] sm:$0xff] }
 0x1b2   : > { %1305 = vmatprep.subr.mxu1 %v1164_v10  ;;  %v1160_v62 = vmax.f32 %v1128_v25, 0.0  ;;  %v1124_v24 = vadd.f32 %v3017_v53, %v996_v35  ;;  %v779_v5 = vadd.f32 %v3019_v55, %v3018_v17  ;;  %v991_v8 = vadd.f32 %v2640_v26, %v791_v16  ;;  %v1179_v35 = vld [vmem:[%s2763_s11] sm:$0xff]  ;;  %v1181_v25 = vld [vmem:[%s2763_s11 + $0x10] sm:$0xff] }
 0x1b3   : > { %1306 = vmatpush1.msra.mxu1 %v1163_v36  ;;  %v1159_v15 = vmax.f32 %v1127_v46, 0.0  ;;  %v1123_v45 = vadd.f32 %v3017_v53, %v995_v33  ;;  %v990_v23 = vadd.f32 %v2651_v39, %v787_v42  ;;  %v1158_v61 = vmax.f32 %v1126_v50, 0.0  ;;  %v1038_v39 = vpop.permute.xlu0 %1037  ;;  %v1183_v16 = vld [vmem:[%s2763_s11 + $0x20] sm:$0xff]  ;;  %v1185_v33 = vld [vmem:[%s2763_s11 + $0x30] sm:$0xff]  ;;  %v1186_v36 = vld [vmem:[%s2763_s11 + $0x38] sm:$0xff] }
 0x1b4   : > { %1307 = vmatprep.subr.mxu1 %v1162_v18  ;;  %v1122_v28 = vadd.f32 %v1053_v56, %v994_v43  ;;  %v989_v48 = vadd.f32 %v2647_v51, %v785_v40  ;;  %v1157_v21 = vmax.f32 %v1125_v14, 0.0  ;;  %v1121_v0 = vadd.f32 %v1053_v56, %v993_v30  ;;  %v1187_v46 = vld [vmem:[%s2763_s11 + $0x40] sm:$0xff]  ;;  %v1189_v42 = vld [vmem:[%s2763_s11 + $0x50] sm:$0xff]  ;;  %v1192_v18 = vld [vmem:[%s2763_s11 + $0x68] sm:$0xff] }
 0x1b5   : > { %1308 = vmatpush1.msra.mxu1 %v1161_v20  ;;  %v988_v4 = vadd.f32 %v2670_v49, %v781_v6  ;;  %v1156_v38 = vmax.f32 %v1124_v24, 0.0  ;;  %v1120_v26 = vadd.f32 %v1048_v34, %v992_v1  ;;  %v987_v27 = vadd.f32 %v2658_v11, %v779_v5  ;;  %v1191_v43 = vld [vmem:[%s2763_s11 + $0x60] sm:$0xff]  ;;  %v1194_v50 = vld [vmem:[%s2763_s11 + $0x78] sm:$0xff]  ;;  %s2859_s11 = scalar_lea.sflag [#allocation5], %s439_s28 }
 0x1b6   : > { %1309 = vmatprep.subr.mxu1 %v1160_v62  ;;  %v1155_v52 = vmax.f32 %v1123_v45, 0.0  ;;  %v1119_v44 = vadd.f32 %v1048_v34, %v991_v8  ;;  %v1118_v59 = vadd.f32 %v1043_v32, %v990_v23  ;;  %v1154_v19 = vmax.f32 %v1122_v28, 0.0  ;;  %v1289_v28 = vpop.permute.xlu1 %1288 }
 0x1b7   : > { %1310 = vmatpush1.msra.mxu1 %v1159_v15  ;;  %v1117_v51 = vadd.f32 %v1043_v32, %v989_v48  ;;  %v1153_v12 = vmax.f32 %v1121_v0, 0.0  ;;  %v1116_v56 = vadd.f32 %v1038_v39, %v988_v4  ;;  %v1152_v49 = vmax.f32 %v1120_v26, 0.0 }
 0x1b8   : > { %1311 = vmatprep.subr.mxu1 %v1158_v61  ;;  %v1115_v54 = vadd.f32 %v1038_v39, %v987_v27  ;;  %v1151_v29 = vmax.f32 %v1119_v44, 0.0  ;;  %v1150_v60 = vmax.f32 %v1118_v59, 0.0  ;;  %v3020_v10 = vmov 0.0  }
 0x1b9   : > { %1312 = vmatpush1.msra.mxu1 %v1157_v21  ;;  %v1149_v11 = vmax.f32 %v1117_v51, 0.0  ;;  %v1148_v3 = vmax.f32 %v1116_v56, 0.0  ;;  %v1284_v21 = vpop.permute.xlu0 %1283 }
 0x1ba   : > { %1313 = vmatprep.subr.mxu1 %v1156_v38  ;;  %v1147_v63 = vmax.f32 %v1115_v54, 0.0  ;;  %v1279_v32 = vpop.permute.xlu1 %1278 }
 0x1bb   : > { %1314 = vmatpush1.msra.mxu1 %v1155_v52 }
 0x1bc   : > { %1315 = vmatprep.subr.mxu1 %v1154_v19 }
 0x1bd   : > { %1316 = vmatpush1.msra.mxu1 %v1153_v12  ;;  %v1274_v26 = vpop.permute.xlu0 %1273 }
 0x1be   : > { %1317 = vmatprep.subr.mxu1 %v1152_v49  ;;  %v1269_v44 = vpop.permute.xlu1 %1268 }
 0x1bf   : > { %1318 = vmatpush1.msra.mxu1 %v1151_v29 }
 0x1c0   : > { %1319 = vmatprep.subr.mxu1 %v1150_v60 }
 0x1c1   : > { %1320 = vmatpush1.msra.mxu1 %v1149_v11  ;;  %v1264_v59 = vpop.permute.xlu0 %1263 }
 0x1c2   : > { %1321 = vmatprep.subr.mxu1 %v1148_v3  ;;  %v1259_v54 = vpop.permute.xlu1 %1258 }
 0x1c3   : > { %1322 = vmatpush1.msra.mxu1 %v1147_v63 }
 0x1c4   : > { %1356 = vmatmul.mubr.f32.vlgmr.msra.gmra.mxu1 %v1179_v35 }
 0x1c5   : > { %1361 = vmatprep.mubr.f32.mxu1 %v3020_v10  ;;  %v1254_v3 = vpop.permute.xlu0 %1253 }
 0x1c8   : > { %1362 = vmatmul.mubr.f32.gmra.mxu1 %v1180_v22 }
 0x1c9   : > { %1367 = vmatprep.mubr.f32.mxu1 %v3020_v10 }
 0x1cc   : > { %1368 = vmatmul.mubr.f32.gmra.mxu1 %v1181_v25 }
 0x1cd   : > { %1373 = vmatprep.mubr.f32.mxu1 %v3020_v10 }
 0x1d0   : > { %1374 = vmatmul.mubr.f32.gmra.mxu1 %v1182_v57 }
 0x1d1   : > { %1379 = vmatprep.mubr.f32.mxu1 %v3020_v10 }
 0x1d4   : > { %1380 = vmatmul.mubr.f32.gmra.mxu1 %v1183_v16 }
 0x1d5   : > { %1385 = vmatprep.mubr.f32.mxu1 %v3020_v10 }
 0x1d8   : > { %1386 = vmatmul.mubr.f32.gmra.mxu1 %v1184_v2 }
 0x1d9   : > { %1391 = vmatprep.mubr.f32.mxu1 %v3020_v10 }
 0x1dc   : > { %1392 = vmatmul.mubr.f32.gmra.mxu1 %v1185_v33 }
 0x1dd   : > { %1397 = vmatprep.mubr.f32.mxu1 %v3020_v10 }
 0x1e0   : > { %1398 = vmatmul.mubr.f32.gmra.mxu1 %v1186_v36  ;;  %v1249_v36 = vpop.permute.xlu1 %1248 }
 0x1e1   : > { %1403 = vmatprep.mubr.f32.mxu1 %v3020_v10 }
 0x1e4   : > { %1404 = vmatmul.mubr.f32.gmra.mxu1 %v1187_v46 }
 0x1e5   : > { %1409 = vmatprep.mubr.f32.mxu1 %v3020_v10 }
 0x1e8   : > { %1410 = vmatmul.mubr.f32.gmra.mxu1 %v1188_v58 }
 0x1e9   : > { %1415 = vmatprep.mubr.f32.mxu1 %v3020_v10 }
 0x1ec   : > { %1416 = vmatmul.mubr.f32.gmra.mxu1 %v1189_v42 }
 0x1ed   : > { %1421 = vmatprep.mubr.f32.mxu1 %v3020_v10 }
 0x1f0   : > { %1422 = vmatmul.mubr.f32.gmra.mxu1 %v1190_v7 }
 0x1f1   : > { %1427 = vmatprep.mubr.f32.mxu1 %v3020_v10 }
 0x1f4   : > { %1428 = vmatmul.mubr.f32.gmra.mxu1 %v1191_v43  ;;  %v1244_v43 = vpop.permute.xlu0 %1243 }
 0x1f5   : > { %1433 = vmatprep.mubr.f32.mxu1 %v3020_v10 }
 0x1f8   : > { %1434 = vmatmul.mubr.f32.gmra.mxu1 %v1192_v18 }
 0x1f9   : > { %1439 = vmatprep.mubr.f32.mxu1 %v3020_v10 }
 0x1fc   : > { %1440 = vmatmul.mubr.f32.gmra.mxu1 %v1193_v37 }
 0x1fd   : > { %1445 = vmatprep.mubr.f32.mxu1 %v3020_v10 }
 0x200   : > { %1446 = vmatmul.mubr.f32.gmra.mxu1 %v1194_v50 }
 0x284   : > { %v2796_v9 = vpop.f32.mrf.mxu1 }
 0x286   : > { %v2798_v31 = vpop.f32.mrf.mxu1 }
 0x288   : > { %v2800_v40 = vpop.f32.mrf.mxu1 }
 0x28a   : > { %v2802_v41 = vpop.f32.mrf.mxu1 }
 0x28c   : > { %v2804_v30 = vpop.f32.mrf.mxu1 }
 0x28e   : > { %v2806_v20 = vpop.f32.mrf.mxu1 }
 0x290   : > { %v2808_v14 = vpop.f32.mrf.mxu1 }
 0x292   : > { %v2810_v34 = vpop.f32.mrf.mxu1 }
 0x294   : > { %v2812_v13 = vpop.f32.mrf.mxu1 }
 0x296   : > { %v2814_v47 = vpop.f32.mrf.mxu1 }
 0x298   : > { %v2816_v6 = vpop.f32.mrf.mxu1 }
 0x29a   : > { %v2818_v1 = vpop.f32.mrf.mxu1 }
 0x29c   : > { %v2820_v62 = vpop.f32.mrf.mxu1 }
 0x29e   : > { %v2822_v53 = vpop.f32.mrf.mxu1 }
 0x2a0   : > { %v2824_v24 = vpop.f32.mrf.mxu1 }
 0x2a2   : > { %v2826_v17 = vpop.f32.mrf.mxu1 }
 0x2a4   : > { %v1405_v55 = vpop.f32.mrf.mxu1 }
 0x2a6   : > { %v1407_v5 = vpop.f32.mrf.mxu1 }
 0x2a8   : > { %v1411_v8 = vpop.f32.mrf.mxu1 }
 0x2aa   : > { %v1413_v15 = vpop.f32.mrf.mxu1 }
 0x2ab   : > { %v1414_v50 = vadd.f32 %v1413_v15, %v1259_v54 }
 0x2ac   : > { %v1417_v45 = vpop.f32.mrf.mxu1 }
 0x2ad   : > { %v1418_v18 = vadd.f32 %v1417_v45, %v1264_v59  ;;  %v1234_v45 = vpop.permute.xlu0 %1233 }
 0x2ae   : > { %v1419_v23 = vpop.f32.mrf.mxu1 }
 0x2af   : > { %v1420_v42 = vadd.f32 %v1419_v23, %v1264_v59  ;;  %v1402_v23 = vadd.f32 %v2826_v17, %v1249_v36 }
 0x2b0   : > { %v1423_v61 = vpop.f32.mrf.mxu1 }
 0x2b1   : > { %v1424_v46 = vadd.f32 %v1423_v61, %v1269_v44  ;;  %v1406_v61 = vadd.f32 %v1405_v55, %v1254_v3 }
 0x2b2   : > { %v1425_v48 = vpop.f32.mrf.mxu1 }
 0x2b3   : > { %v1426_v2 = vadd.f32 %v1425_v48, %v1269_v44  ;;  %v1408_v48 = vadd.f32 %v1407_v5, %v1254_v3  ;;  %v1394_v5 = vadd.f32 %v2820_v62, %v1244_v43  ;;  %v1468_v44 = vmax.f32 %v1406_v61, 0.0 }
 0x2b4   : > { %v1429_v0 = vpop.f32.mrf.mxu1 }
 0x2b5   : > { %v1430_v57 = vadd.f32 %v1429_v0, %v1274_v26  ;;  %v1474_v0 = vmax.f32 %v1424_v46, 0.0 }
 0x2b6   : > { %v1431_v4 = vpop.f32.mrf.mxu1 }
 0x2b7   : > { %v1432_v22 = vadd.f32 %v1431_v4, %v1274_v26  ;;  %v1476_v37 = vmax.f32 %v1430_v57, 0.0  ;;  %v1473_v4 = vmax.f32 %v1420_v42, 0.0  ;;  %v1471_v26 = vmax.f32 %v1414_v50, 0.0 }
 0x2b8   : > { %v1435_v38 = vpop.f32.mrf.mxu1 }
 0x2b9   : > { %v1436_v63 = vadd.f32 %v1435_v38, %v1279_v32  ;;  %v1477_v7 = vmax.f32 %v1432_v22, 0.0  ;;  %v1472_v38 = vmax.f32 %v1418_v18, 0.0 }
 0x2ba   : > { %v1437_v27 = vpop.f32.mrf.mxu1 }
 0x2bb   : > { %v1438_v60 = vadd.f32 %v1437_v27, %v1279_v32  ;;  %v1478_v58 = vmax.f32 %v1436_v63, 0.0  ;;  %v1239_v32 = vpop.permute.xlu1 %1238  ;;  %v1400_v27 = vadd.f32 %v2824_v24, %v1249_v36  ;;  %v1384_v24 = vadd.f32 %v2814_v47, %v1234_v45 }
 0x2bc   : > { %v1441_v52 = vpop.f32.mrf.mxu1  ;;  %v1390_v55 = vadd.f32 %v2818_v1, %v1239_v32  ;;  %v1388_v59 = vadd.f32 %v2816_v6, %v1239_v32 }
 0x2bd   : > { %v1442_v29 = vadd.f32 %v1441_v52, %v1284_v21  ;;  %v1479_v33 = vmax.f32 %v1438_v60, 0.0  ;;  %v1469_v52 = vmax.f32 %v1408_v48, 0.0 }
 0x2be   : > { %v1443_v39 = vpop.f32.mrf.mxu1 }
 0x2bf   : > { %v1444_v56 = vadd.f32 %v1443_v39, %v1284_v21  ;;  %v1480_v16 = vmax.f32 %v1442_v29, 0.0  ;;  %v1412_v21 = vadd.f32 %v1411_v8, %v1259_v54  ;;  %v1396_v8 = vadd.f32 %v2822_v53, %v1244_v43  ;;  %v1229_v17 = vpop.permute.xlu1 %1228  ;;  %v1224_v53 = vpop.permute.xlu0 %1223 }
 0x2c0   : > { %v1447_v19 = vpop.f32.mrf.mxu1  ;;  %v1467_v39 = vmax.f32 %v1402_v23, 0.0  ;;  %v1378_v62 = vadd.f32 %v2810_v34, %v1229_v17  ;;  %v1376_v1 = vadd.f32 %v2808_v14, %v1229_v17  ;;  %v1462_v54 = vmax.f32 %v1388_v59, 0.0 }
 0x2c1   : > { %v1448_v51 = vadd.f32 %v1447_v19, %v1289_v28  ;;  %v1481_v25 = vmax.f32 %v1444_v56, 0.0  ;;  %v1470_v15 = vmax.f32 %v1412_v21, 0.0  ;;  %v1466_v19 = vmax.f32 %v1400_v27, 0.0 }
 0x2c2   : > { %v1449_v12 = vpop.f32.mrf.mxu1  ;;  %v1464_v56 = vmax.f32 %v1394_v5, 0.0  ;;  %v1372_v6 = vadd.f32 %v2806_v20, %v1224_v53  ;;  %v1461_v29 = vmax.f32 %v1384_v24, 0.0  ;;  %v1370_v60 = vadd.f32 %v2804_v30, %v1224_v53 }
 0x2c3   : > { %v1450_v49 = vadd.f32 %v1449_v12, %v1289_v28  ;;  %v1482_v35 = vmax.f32 %v1448_v51, 0.0  ;;  %v1475_v28 = vmax.f32 %v1426_v2, 0.0  ;;  %v1465_v51 = vmax.f32 %v1396_v8, 0.0  ;;  %v1219_v47 = vpop.permute.xlu1 %1218  ;;  %v1214_v34 = vpop.permute.xlu0 %1213 }
 0x2c4   : > { %v1382_v12 = vadd.f32 %v2812_v13, %v1234_v45  ;;  %v1366_v13 = vadd.f32 %v2802_v41, %v1219_v47  ;;  %v1459_v3 = vmax.f32 %v1378_v62, 0.0  ;;  %v1364_v63 = vadd.f32 %v2800_v40, %v1219_v47 }
 0x2c5   : > { %v1483_v11 = vmax.f32 %v1450_v49, 0.0  ;;  %v1463_v49 = vmax.f32 %v1390_v55, 0.0  ;;  %v1458_v14 = vmax.f32 %v1376_v1, 0.0  ;;  %v1457_v20 = vmax.f32 %v1372_v6, 0.0 }
 0x2c6   : > { %v1358_v22 = vadd.f32 %v2796_v9, %v1214_v34  ;;  %v1455_v41 = vmax.f32 %v1366_v13, 0.0  ;;  %v1454_v30 = vmax.f32 %v1364_v63, 0.0  ;;  %v1485_v9 = vld [vmem:[%s484_s19 + $0x8] sm:$0xff] }
 0x2c7   : > { %1498 = vmatprep.subr.mxu0 %v1483_v11  ;;  %v1460_v11 = vmax.f32 %v1382_v12, 0.0 }
 0x2c8   : > { %1499 = vmatpush1.msra.mxu0 %v1482_v35  ;;  %v1360_v35 = vadd.f32 %v2798_v31, %v1214_v34  ;;  %v1452_v57 = vmax.f32 %v1358_v22, 0.0  ;;  %v1484_v31 = vld [vmem:[%s484_s19] sm:$0xff]  ;;  %s1911_s19 = scalar_lea.vmem %s1910_s12, 1024 }
 0x2c9   : > { %1500 = vmatprep.subr.mxu0 %v1481_v25  ;;  %v1456_v25 = vmax.f32 %v1370_v60, 0.0  ;;  %p1913_p8 = scmp.lt.s32.totalorder %s1911_s19, %s1905_s16 }
 0x2ca   : > { %1501 = vmatpush1.msra.mxu0 %v1480_v16  ;;  %v1453_v40 = vmax.f32 %v1360_v35, 0.0  ;;  %v1491_v16 = vpop.permute.xlu1 %1490 }
 0x2cb   : > { %1502 = vmatprep.subr.mxu0 %v1479_v33  ;;  %p1914_p10 = por %p1913_p8, %p1912_p7 }
 0x2cc   : > { %1503 = vmatpush1.msra.mxu0 %v1478_v58  ;;  %v1496_v58 = vpop.permute.xlu0 %1495 }
 0x2cd   : > { %1504 = vmatprep.subr.mxu0 %v1477_v7  ;;  %p1915_p11 = pnand %p1914_p10, %p1908_p6 }
 0x2ce   : > { %1505 = vmatpush1.msra.mxu0 %v1476_v37 }
 0x2cf   : > { %1506 = vmatprep.subr.mxu0 %v1475_v28 }
 0x2d0   : > { %1507 = vmatpush1.msra.mxu0 %v1474_v0 }
 0x2d1   : > { %1508 = vmatprep.subr.mxu0 %v1473_v4 }
 0x2d2   : > { %1509 = vmatpush1.msra.mxu0 %v1472_v38 }
 0x2d3   : > { %1510 = vmatprep.subr.mxu0 %v1471_v26 }
 0x2d4   : > { %1511 = vmatpush1.msra.mxu0 %v1470_v15 }
 0x2d5   : > { %1512 = vmatprep.subr.mxu0 %v1469_v52 }
 0x2d6   : > { %1513 = vmatpush1.msra.mxu0 %v1468_v44 }
 0x2d7   : > { %1514 = vmatprep.subr.mxu0 %v1467_v39 }
 0x2d8   : > { %1515 = vmatpush1.msra.mxu0 %v1466_v19 }
 0x2d9   : > { %1516 = vmatprep.subr.mxu0 %v1465_v51 }
 0x2da   : > { %1517 = vmatpush1.msra.mxu0 %v1464_v56 }
 0x2db   : > { %1518 = vmatprep.subr.mxu0 %v1463_v49 }
 0x2dc   : > { %1519 = vmatpush1.msra.mxu0 %v1462_v54 }
 0x2dd   : > { %1520 = vmatprep.subr.mxu0 %v1461_v29 }
 0x2de   : > { %1521 = vmatpush1.msra.mxu0 %v1460_v11 }
 0x2df   : > { %1522 = vmatprep.subr.mxu0 %v1459_v3 }
 0x2e0   : > { %1523 = vmatpush1.msra.mxu0 %v1458_v14 }
 0x2e1   : > { %1524 = vmatprep.subr.mxu0 %v1457_v20 }
 0x2e2   : > { %1525 = vmatpush1.msra.mxu0 %v1456_v25 }
 0x2e3   : > { %1526 = vmatprep.subr.mxu0 %v1455_v41 }
 0x2e4   : > { %1527 = vmatpush1.msra.mxu0 %v1454_v30 }
 0x2e5   : > { %1528 = vmatprep.subr.mxu0 %v1453_v40 }
 0x2e6   : > { %1529 = vmatpush1.msra.mxu0 %v1452_v57 }
 0x2e7   : > { %1563 = vmatmul.mubr.f32.vlgmr.msra.gmra.mxu0 %v1484_v31 }
 0x2e8   : > { %1568 = vmatprep.mubr.f32.mxu0 %v3020_v10 }
 0x2eb   : > { %1569 = vmatmul.mubr.f32.gmra.mxu0 %v1485_v9 }
 0x3a7   : > { %v1564_v2 = vpop.f32.mrf.mxu0 }
 0x3a8   : > { %v1565_v33 = vadd.f32 %v1564_v2, %v1491_v16 }
 0x3a9   : > { %v1566_v36 = vpop.f32.mrf.mxu0 }
 0x3aa   : > { %1575 = vst [vmem:[%s441_s20] sm:$0xff] %v1565_v33  ;;  %v1567_v46 = vadd.f32 %v1566_v36, %v1491_v16 }
 0x3ab   : > { %v1570_v42 = vpop.f32.mrf.mxu0 }
 0x3ac   : > { %1576 = vst [vmem:[%s441_s20 + $0x8] sm:$0xff] %v1567_v46  ;;  %v1571_v7 = vadd.f32 %v1570_v42, %v1496_v58 }
 0x3ad   : > { %v1572_v10 = vpop.f32.mrf.mxu0 }
 0x3ae   : > { %1577 = vst [vmem:[%s441_s20 + $0x10] sm:$0xff] %v1571_v7  ;;  %v1573_v43 = vadd.f32 %v1572_v10, %v1496_v58 }
 0x3b0   : > { %1578 = vst [vmem:[%s441_s20 + $0x18] sm:$0xff] %v1573_v43 }
 0x3b1   : > { %1918 = shalt.err (!%p1915_p11)
}
 0x3b2   : > { %s1919_s28 = scalar_lea.hbm %s2857_s10, 512  ;;  %s1923_s24 = scalar_lea.hbm %s2913_s9, 1024 }
 0x3b3   : > { %p1920_p12 = scmp.ne.s32.totalorder %s2857_s10, %s1919_s28  ;;  %p1924_p2 = scmp.lt.s32.totalorder %s2857_s10, %s2913_s9 }
 0x3b4   : > { %p1925_p3 = scmp.lt.s32.totalorder %s1923_s24, %s1919_s28 }
 0x3b5   : > { %p1921_p0 = pnand %p1920_p12, %p2086_p9 }
 0x3b6   : > { %p1926_p4 = por %p1925_p3, %p1924_p2 }
 0x3b7   : > { %p1922_p1 = pneg %p1921_p0 }
 0x3b9   : > { %p1927_p5 = pnand %p1926_p4, %p1922_p1 }
 0x3bb   : > { %1930 = shalt.err (!%p1927_p5)
}
 0x3bc   : > { %s1991_s16 = smov 256   ;;  %s1992_s29 = smov 16  }
 0x3bd   : > { %1813 = dma.vmem_to_hbm [thread:$0]  (%p2086_p9), %s2852_s22, 512, %s2857_s10, %s2859_s11, %s1991_s16, %s1991_s16, %s1992_s29  }
 0x3be PF: > { %p1819_p6 = scmp.ge.s32.totalorder %s1983_s18, 2  ;;  %s1610_s12 = sand.u32 1, %s1963_s14  }
 0x3bf   : > { %s1611_s19 = scalar_lea.sflag [#allocation5], %s1610_s12 }
 0x3c0   : > { %p1816_p7 = pnand %p1819_p6, %p2093_p13 }
 0x3c2   : > { %p1817_p8 = pneg %p1816_p7 }
 0x3c4   : > { %1958 = dma.done.wait (%p1817_p8), %s1611_s19, 512  }
 0x3c5   : > { %1960 = vsyncadd (%p1817_p8), %s1611_s19, 4294966784  ;;  %s28_s18 = sadd.s32 1, %s1983_s18   ;;  %s3021_s14 = smov %s1967_s15 }
 0x3c6   : > { %p25_p10 = scmp.ge.s32.totalorder %s28_s18, 4   ;;  %s3022_s15 = smov %s1971_s0 }
 0x3c7   : > { %s3023_s0 = smov %s2099_s26  ;;  %s3024_s16 = smov %s1979_s17 }
 0x3c8   : > { %s3025_s17 = smov %s3027_s21  ;;  %27 = sbr.rel (!%p25_p10) target bundleno = 19 (0x13), region = 108 }
 0x3cd   :  { %1616 = vsyncpa [#allocation5], 1 }
 0x3ce   :  { %1618 = vsyncpa [#allocation5 + $0x1], 1 }

</bundles_post_ra>
